<compile_context>
chip_gen: v7x
topology: tpu7x:2x2x1
jax: 0.10.0
libtpu: 0.0.40
codegen_flags: <defaults>
</compile_context>

<pallas_src>
import jax
import jax.numpy as jnp
from jax import lax
from jax.experimental import pallas as pl
from jax.experimental.pallas import tpu as pltpu


# ---------------------------------------------------------------------------
# generation-aware VMEM budget + tile choosers
# ---------------------------------------------------------------------------
_VMEM_CACHE = None


def _vmem_limit():
    """~48 MiB on 128-MiB-VMEM parts (v5e/v6e), ~36 MiB on 64-MiB parts (v7x)."""
    global _VMEM_CACHE
    if _VMEM_CACHE is None:
        cap = 128 * 1024 * 1024
        try:
            cap = int(getattr(pltpu.get_tpu_info(), "vmem_capacity_bytes", cap))
        except Exception:
            pass
        if cap >= 96 * 1024 * 1024:
            _VMEM_CACHE = 48 * 1024 * 1024
        else:
            _VMEM_CACHE = min(36 * 1024 * 1024, (cap * 9) // 16)
    return _VMEM_CACHE


def _pick_tile(n, m, budget):
    """Largest lane-aligned N-tile whose per-step (tn, M) working set fits the budget."""
    for t in (1024, 512, 256, 128):
        if n % t == 0 and 8 * t * m * 4 <= budget // 2:
            return t
    return n  # ragged / tiny N: whole-row block


def _pick_conv_tile(n, k, cmax, budget):
    """Largest lane-aligned N-tile for the discriminator layers (K rows x cmax channels)."""
    per_lane = 10 * k * cmax          # ~bytes of VMEM per N-lane across double buffers
    for t in (512, 256, 128):
        if n % t == 0 and 2 * per_lane * t <= budget:
            return t
    return n


def _leaky(x, slope=0.2):
    return jnp.where(x >= 0, x, slope * x)


# ---------------------------------------------------------------------------
# Pallas kernel 1: softmax(-pairwise_distance) score map    grid = (B, N-tiles)
#   xx / yy are computed in-kernel on the resident tiles (no precomputed inputs).
# ---------------------------------------------------------------------------
def _scores_kernel(xt_ref, y_ref, scores_ref):
    xt = xt_ref[0]                                           # (Nt, C)
    y = y_ref[0]                                             # (C, M)
    xx = jnp.sum(xt * xt, axis=1, keepdims=True)             # (Nt, 1)
    yy = jnp.sum(y * y, axis=0, keepdims=True)               # (1, M)
    inner = -2.0 * jnp.dot(xt, y, preferred_element_type=jnp.float32)
    d = xx + inner + yy
    d_sq = jnp.maximum(d, 0.0)
    err = (d_sq <= 0.0).astype(jnp.float32)
    dist = jnp.sqrt(d_sq + err * 1e-16) * (1.0 - err)
    neg = -dist
    m = jnp.max(neg, axis=1, keepdims=True)
    e = jnp.exp(neg - m)
    inv = pl.reciprocal(jnp.sum(e, axis=1, keepdims=True), approx=True)
    scores_ref[0] = e * inv


def pairwise_scores(x_emb_t, y_emb):
    """x_emb_t: (B, N, C) source embedding (transposed), y_emb: (B, C, M)."""
    B, N, C = x_emb_t.shape
    M = y_emb.shape[2]
    vmem = _vmem_limit()
    tn = _pick_tile(N, M, vmem)
    return pl.pallas_call(
        _scores_kernel,
        out_shape=jax.ShapeDtypeStruct((B, N, M), jnp.float32),
        grid_spec=pltpu.PrefetchScalarGridSpec(
            num_scalar_prefetch=0, grid=(B, N // tn),
            in_specs=[pl.BlockSpec((1, tn, C), lambda b, i: (b, i, 0)),
                      pl.BlockSpec((1, C, M), lambda b, i: (b, 0, 0))],
            out_specs=pl.BlockSpec((1, tn, M), lambda b, i: (b, i, 0))),
        compiler_params=pltpu.CompilerParams(
            dimension_semantics=("parallel", "parallel"),
            vmem_limit_bytes=vmem),
    )(x_emb_t, y_emb)


# ---------------------------------------------------------------------------
# Pallas kernel 2: recompute distance + refine + softmax + src_corr + argmax
#   distance_map never leaves VMEM; argmax is taken from the pre-exp values.
# ---------------------------------------------------------------------------
def _refine_kernel(xt_ref, y_ref, sks_ref, tgt_ref, match_ref, corr_ref, amax_ref):
    xt = xt_ref[0]                                           # (Nt, C)
    y = y_ref[0]                                             # (C, M)
    xx = jnp.sum(xt * xt, axis=1, keepdims=True)
    yy = jnp.sum(y * y, axis=0, keepdims=True)
    inner = -2.0 * jnp.dot(xt, y, preferred_element_type=jnp.float32)
    d = xx + inner + yy
    d_sq = jnp.maximum(d, 0.0)
    err = (d_sq <= 0.0).astype(jnp.float32)
    dist = jnp.sqrt(d_sq + err * 1e-16) * (1.0 - err)
    refined = jnp.exp(sks_ref[0]) * dist
    neg = -refined
    m = jnp.max(neg, axis=1, keepdims=True)
    # fused row-argmax (first occurrence) over M taken from pre-exp values (reuses m)
    nt, mm = neg.shape
    col = lax.broadcasted_iota(jnp.int32, (nt, mm), 1)
    amax_ref[0] = jnp.min(jnp.where(neg >= m, col, mm), axis=1, keepdims=True)
    e = jnp.exp(neg - m)
    inv = pl.reciprocal(jnp.sum(e, axis=1, keepdims=True), approx=True)
    match = e * inv                                          # softmax(-refined, axis=-1)
    match_ref[0] = match
    # src_corr tile:  tgt (3, M) @ match^T -> (3, Nt)
    corr_ref[0] = lax.dot_general(tgt_ref[0], match, (((1,), (1,)), ((), ())),
                                  preferred_element_type=jnp.float32)


def refine_and_correspond(x_emb_t, y_emb, src_knn_scores, tgt):
    B, N, C = x_emb_t.shape
    M = y_emb.shape[2]
    vmem = _vmem_limit()
    tn = _pick_tile(N, M, vmem)
    return pl.pallas_call(
        _refine_kernel,
        out_shape=(jax.ShapeDtypeStruct((B, N, M), jnp.float32),
                   jax.ShapeDtypeStruct((B, 3, N), jnp.float32),
                   jax.ShapeDtypeStruct((B, N, 1), jnp.int32)),
        grid_spec=pltpu.PrefetchScalarGridSpec(
            num_scalar_prefetch=0, grid=(B, N // tn),
            in_specs=[pl.BlockSpec((1, tn, C), lambda b, i: (b, i, 0)),
                      pl.BlockSpec((1, C, M), lambda b, i: (b, 0, 0)),
                      pl.BlockSpec((1, tn, M), lambda b, i: (b, i, 0)),
                      pl.BlockSpec((1, 3, M), lambda b, i: (b, 0, 0))],
            out_specs=[pl.BlockSpec((1, tn, M), lambda b, i: (b, i, 0)),
                       pl.BlockSpec((1, 3, tn), lambda b, i: (b, 0, i)),
                       pl.BlockSpec((1, tn, 1), lambda b, i: (b, i, 0))]),
        compiler_params=pltpu.CompilerParams(
            dimension_semantics=("parallel", "parallel"),
            vmem_limit_bytes=vmem),
    )(x_emb_t, y_emb, src_knn_scores, tgt)
    # TODO(synk): when N >> num_keypoints, recompute only the top-k rows of the matching
    # map in a follow-up kernel instead of writing the full (B, N, M) map to HBM.


# ---------------------------------------------------------------------------
# Pallas kernel 3: (3,1)-kernel conv over the (B, K, Cin, N) layout, N-tiled.
#   Taps are per-K-row matmuls with boundary-skip (implicit zero padding in K);
#   optional fused BN+LeakyReLU input prologue; per-tile BN sum/sumsq outputs.
# ---------------------------------------------------------------------------
def _make_conv31_kernel(K, has_prologue, compute_dtype):
    def kernel(*refs):
        if has_prologue:
            x_ref, sc_ref, sh_ref, w_ref, b_ref, y_ref, s1_ref, s2_ref = refs
        else:
            x_ref, w_ref, b_ref, y_ref, s1_ref, s2_ref = refs
        w = w_ref[...]                                       # (3, Cout, Cin)
        b = b_ref[...]                                       # (Cout, 1)
        # activate each input K-row once (previous layer's folded BN + LeakyReLU)
        xact = []
        for jj in range(K):
            xr = x_ref[0, jj]                                # (Cin, tn)
            if has_prologue:
                xr = sc_ref[...] * xr.astype(jnp.float32) + sh_ref[...]
                xr = jnp.where(xr >= 0, xr, 0.2 * xr)
            xact.append(xr.astype(compute_dtype))
        s1 = jnp.zeros(b.shape, jnp.float32)
        s2 = jnp.zeros(b.shape, jnp.float32)
        for kk in range(K):                                  # 3 taps, zero pad along K
            acc = None
            for dk in range(3):
                jj = kk + dk - 1
                if jj < 0 or jj >= K:
                    continue
                part = jnp.dot(w[dk], xact[jj], preferred_element_type=jnp.float32)
                acc = part if acc is None else acc + part
            yk = acc + b                                     # (Cout, tn) raw (pre-BN), f32
            y_ref[0, kk] = yk.astype(y_ref.dtype)
            s1 = s1 + jnp.sum(yk, axis=1, keepdims=True)
            s2 = s2 + jnp.sum(yk * yk, axis=1, keepdims=True)
        s1_ref[0, 0] = s1
        s2_ref[0, 0] = s2
    return kernel


def conv31_layer(x4d, w3, bias, scale, shift, *, K, tn, out_dtype, compute_dtype):
    """x4d: (B, K, Cin, N).  w3: (3, Cout, Cin).  scale/shift: optional (Cin, 1) affine
    of the previous layer's BN (applied with LeakyReLU inside the kernel).
    Returns (raw_out (B, K, Cout, N), per-tile sum, per-tile sumsq)."""
    B, Kx, Cin, N = x4d.shape
    assert Kx == K
    Cout = w3.shape[1]
    NT = N // tn
    vmem = _vmem_limit()
    has_pro = scale is not None
    kernel = _make_conv31_kernel(K, has_pro, compute_dtype)

    in_specs = [pl.BlockSpec((1, K, Cin, tn), lambda b, i: (b, 0, 0, i))]
    args = [x4d]
    if has_pro:
        in_specs += [pl.BlockSpec((Cin, 1), lambda b, i: (0, 0)),
                     pl.BlockSpec((Cin, 1), lambda b, i: (0, 0))]
        args += [scale, shift]
    in_specs += [pl.BlockSpec((3, Cout, Cin), lambda b, i: (0, 0, 0)),
                 pl.BlockSpec((Cout, 1), lambda b, i: (0, 0))]
    args += [w3, bias.reshape(Cout, 1)]

    return pl.pallas_call(
        kernel,
        out_shape=(jax.ShapeDtypeStruct((B, K, Cout, N), out_dtype),
                   jax.ShapeDtypeStruct((B, NT, Cout, 1), jnp.float32),
                   jax.ShapeDtypeStruct((B, NT, Cout, 1), jnp.float32)),
        grid_spec=pltpu.PrefetchScalarGridSpec(
            num_scalar_prefetch=0, grid=(B, NT),
            in_specs=in_specs,
            out_specs=[pl.BlockSpec((1, K, Cout, tn), lambda b, i: (b, 0, 0, i)),
                       pl.BlockSpec((1, 1, Cout, 1), lambda b, i: (b, i, 0, 0)),
                       pl.BlockSpec((1, 1, Cout, 1), lambda b, i: (b, i, 0, 0))]),
        compiler_params=pltpu.CompilerParams(
            dimension_semantics=("parallel", "parallel"),
            vmem_limit_bytes=vmem),
    )(*args)


# ---------------------------------------------------------------------------
# Pallas kernel 4: fused activated-difference + concatenated (m2|m3) first pw conv.
#   x2 = lrelu(BN(x)) - lrelu(BN(y)) never touches HBM; 32 output channels cover
#   both heads at once.  Emits per-tile BN sum/sumsq.
# ---------------------------------------------------------------------------
def _make_head1_kernel(K):
    def kernel(x_ref, y_ref, xsc_ref, xsh_ref, ysc_ref, ysh_ref, w_ref, b_ref,
               o_ref, s1_ref, s2_ref):
        w = w_ref[...]                                       # (32, 2*dim) bf16
        b = b_ref[...]                                       # (32, 1) f32
        s1 = jnp.zeros(b.shape, jnp.float32)
        s2 = jnp.zeros(b.shape, jnp.float32)
        for kk in range(K):
            xa = xsc_ref[...] * x_ref[0, kk].astype(jnp.float32) + xsh_ref[...]
            xa = jnp.where(xa >= 0, xa, 0.2 * xa)
            ya = ysc_ref[...] * y_ref[0, kk].astype(jnp.float32) + ysh_ref[...]
            ya = jnp.where(ya >= 0, ya, 0.2 * ya)
            d = (xa - ya).astype(w.dtype)
            ok = jnp.dot(w, d, preferred_element_type=jnp.float32) + b   # (32, tn)
            o_ref[0, kk] = ok
            s1 = s1 + jnp.sum(ok, axis=1, keepdims=True)
            s2 = s2 + jnp.sum(ok * ok, axis=1, keepdims=True)
        s1_ref[0, 0] = s1
        s2_ref[0, 0] = s2
    return kernel


def head1_layer(x2raw, y2raw, xsc, xsh, ysc, ysh, w_cat, b_cat, *, K, tn):
    B, Kx, C2, N = x2raw.shape
    NT = N // tn
    Co = w_cat.shape[0]
    vmem = _vmem_limit()
    return pl.pallas_call(
        _make_head1_kernel(K),
        out_shape=(jax.ShapeDtypeStruct((B, K, Co, N), jnp.float32),
                   jax.ShapeDtypeStruct((B, NT, Co, 1), jnp.float32),
                   jax.ShapeDtypeStruct((B, NT, Co, 1), jnp.float32)),
        grid_spec=pltpu.PrefetchScalarGridSpec(
            num_scalar_prefetch=0, grid=(B, NT),
            in_specs=[pl.BlockSpec((1, K, C2, tn), lambda b, i: (b, 0, 0, i)),
                      pl.BlockSpec((1, K, C2, tn), lambda b, i: (b, 0, 0, i)),
                      pl.BlockSpec((C2, 1), lambda b, i: (0, 0)),
                      pl.BlockSpec((C2, 1), lambda b, i: (0, 0)),
                      pl.BlockSpec((C2, 1), lambda b, i: (0, 0)),
                      pl.BlockSpec((C2, 1), lambda b, i: (0, 0)),
                      pl.BlockSpec((Co, C2), lambda b, i: (0, 0)),
                      pl.BlockSpec((Co, 1), lambda b, i: (0, 0))],
            out_specs=[pl.BlockSpec((1, K, Co, tn), lambda b, i: (b, 0, 0, i)),
                       pl.BlockSpec((1, 1, Co, 1), lambda b, i: (b, i, 0, 0)),
                       pl.BlockSpec((1, 1, Co, 1), lambda b, i: (b, i, 0, 0))]),
        compiler_params=pltpu.CompilerParams(
            dimension_semantics=("parallel", "parallel"),
            vmem_limit_bytes=vmem),
    )(x2raw, y2raw, xsc, xsh, ysc, ysh, w_cat, b_cat.reshape(Co, 1))


# ---------------------------------------------------------------------------
# Pallas kernel 5: pointwise conv with fused BN+LeakyReLU prologue + stats.
#   Used with the block-diagonal (m2|m3) second 16->16 layer weight.
# ---------------------------------------------------------------------------
def _make_pw_bn_kernel(K):
    def kernel(a_ref, sc_ref, sh_ref, w_ref, b_ref, o_ref, s1_ref, s2_ref):
        w = w_ref[...]
        b = b_ref[...]
        s1 = jnp.zeros(b.shape, jnp.float32)
        s2 = jnp.zeros(b.shape, jnp.float32)
        for kk in range(K):
            a = sc_ref[...] * a_ref[0, kk] + sh_ref[...]
            a = jnp.where(a >= 0, a, 0.2 * a)
            ok = jnp.dot(w, a, preferred_element_type=jnp.float32) + b
            o_ref[0, kk] = ok
            s1 = s1 + jnp.sum(ok, axis=1, keepdims=True)
            s2 = s2 + jnp.sum(ok * ok, axis=1, keepdims=True)
        s1_ref[0, 0] = s1
        s2_ref[0, 0] = s2
    return kernel


def pw_head_layer(a, scale, shift, w, bias, *, K, tn):
    B, Kx, Cin, N = a.shape
    NT = N // tn
    Co = w.shape[0]
    vmem = _vmem_limit()
    return pl.pallas_call(
        _make_pw_bn_kernel(K),
        out_shape=(jax.ShapeDtypeStruct((B, K, Co, N), jnp.float32),
                   jax.ShapeDtypeStruct((B, NT, Co, 1), jnp.float32),
                   jax.ShapeDtypeStruct((B, NT, Co, 1), jnp.float32)),
        grid_spec=pltpu.PrefetchScalarGridSpec(
            num_scalar_prefetch=0, grid=(B, NT),
            in_specs=[pl.BlockSpec((1, K, Cin, tn), lambda b, i: (b, 0, 0, i)),
                      pl.BlockSpec((Cin, 1), lambda b, i: (0, 0)),
                      pl.BlockSpec((Cin, 1), lambda b, i: (0, 0)),
                      pl.BlockSpec((Co, Cin), lambda b, i: (0, 0)),
                      pl.BlockSpec((Co, 1), lambda b, i: (0, 0))],
            out_specs=[pl.BlockSpec((1, K, Co, tn), lambda b, i: (b, 0, 0, i)),
                       pl.BlockSpec((1, 1, Co, 1), lambda b, i: (b, i, 0, 0)),
                       pl.BlockSpec((1, 1, Co, 1), lambda b, i: (b, i, 0, 0))]),
        compiler_params=pltpu.CompilerParams(
            dimension_semantics=("parallel", "parallel"),
            vmem_limit_bytes=vmem),
    )(a, scale, shift, w, bias.reshape(Co, 1))


# ---------------------------------------------------------------------------
# Pallas kernel 6: final BN+LeakyReLU of both 16-channel heads + softmax over K
#                  + weighted sum over K, fully fused
# ---------------------------------------------------------------------------
def _make_softk_kernel(K):
    def kernel(a_ref, sc_ref, sh_ref, o_ref):
        sc = sc_ref[...]
        sh = sh_ref[...]
        xf, wt = [], []
        for kk in range(K):
            a = sc * a_ref[0, kk] + sh                       # (32, tn)
            a = jnp.where(a >= 0, a, 0.2 * a)
            xf.append(a[0:16])
            wt.append(a[16:32])
        m = wt[0]
        for kk in range(1, K):
            m = jnp.maximum(m, wt[kk])
        es = [jnp.exp(wt[kk] - m) for kk in range(K)]
        den = es[0]
        for kk in range(1, K):
            den = den + es[kk]
        inv = pl.reciprocal(den, approx=True)
        out = xf[0] * (es[0] * inv)
        for kk in range(1, K):
            out = out + xf[kk] * (es[kk] * inv)
        o_ref[0] = out                                       # (16, tn)
    return kernel


def softk_layer(a, scale, shift, *, K, tn):
    B, Kx, C, N = a.shape
    NT = N // tn
    vmem = _vmem_limit()
    return pl.pallas_call(
        _make_softk_kernel(K),
        out_shape=jax.ShapeDtypeStruct((B, 16, N), jnp.float32),
        grid_spec=pltpu.PrefetchScalarGridSpec(
            num_scalar_prefetch=0, grid=(B, NT),
            in_specs=[pl.BlockSpec((1, K, C, tn), lambda b, i: (b, 0, 0, i)),
                      pl.BlockSpec((C, 1), lambda b, i: (0, 0)),
                      pl.BlockSpec((C, 1), lambda b, i: (0, 0))],
            out_specs=pl.BlockSpec((1, 16, tn), lambda b, i: (b, 0, i))),
        compiler_params=pltpu.CompilerParams(
            dimension_semantics=("parallel", "parallel"),
            vmem_limit_bytes=vmem),
    )(a, scale, shift)


# ---------------------------------------------------------------------------
# Pallas kernel 7: weighted centroids + covariance H (whole batch, single step)
# ---------------------------------------------------------------------------
def _rigid_stats_kernel(src_ref, corr_ref, w_ref, src2_ref, corr2_ref, h_ref):
    src = src_ref[...]          # (B, 3, N)
    corr = corr_ref[...]        # (B, 3, N)
    w = w_ref[...]              # (B, 1, N)
    wsum = jnp.sum(w, axis=2, keepdims=True)
    src2 = jnp.sum(src * w, axis=2, keepdims=True) / wsum
    corr2 = jnp.sum(corr * w, axis=2, keepdims=True) / wsum
    src2_ref[...] = src2
    corr2_ref[...] = corr2
    sc = (src - src2) * w
    cc = corr - corr2
    for b in range(src.shape[0]):                    # B is small and static
        h_ref[b] = lax.dot_general(sc[b], cc[b], (((1,), (1,)), ((), ())),
                                   preferred_element_type=jnp.float32)


def rigid_stats(src, src_corr, weight):
    B = src.shape[0]
    return pl.pallas_call(
        _rigid_stats_kernel,
        out_shape=(jax.ShapeDtypeStruct((B, 3, 1), jnp.float32),
                   jax.ShapeDtypeStruct((B, 3, 1), jnp.float32),
                   jax.ShapeDtypeStruct((B, 3, 3), jnp.float32)),
    )(src, src_corr, weight)


# ---------------------------------------------------------------------------
# Discriminator (Inlier evaluation)
# ---------------------------------------------------------------------------
def init_discriminator_params(key, dim=256):
    ks = jax.random.split(key, 8)

    def w(k, shape, scale=0.05):
        return scale * jax.random.normal(k, shape, jnp.float32)

    p = {}
    p['m1_w1'] = w(ks[0], (dim, 3, 3, 1));        p['m1_b1'] = jnp.zeros((dim,), jnp.float32)
    p['m1_g1'] = jnp.ones((dim,), jnp.float32);   p['m1_be1'] = jnp.zeros((dim,), jnp.float32)
    p['m1_w2'] = w(ks[1], (dim * 2, dim, 3, 1));  p['m1_b2'] = jnp.zeros((dim * 2,), jnp.float32)
    p['m1_g2'] = jnp.ones((dim * 2,), jnp.float32); p['m1_be2'] = jnp.zeros((dim * 2,), jnp.float32)

    p['m2_w1'] = w(ks[2], (16, dim * 2, 1, 1));   p['m2_b1'] = jnp.zeros((16,), jnp.float32)
    p['m2_g1'] = jnp.ones((16,), jnp.float32);    p['m2_be1'] = jnp.zeros((16,), jnp.float32)
    p['m2_w2'] = w(ks[3], (16, 16, 1, 1));        p['m2_b2'] = jnp.zeros((16,), jnp.float32)
    p['m2_g2'] = jnp.ones((16,), jnp.float32);    p['m2_be2'] = jnp.zeros((16,), jnp.float32)

    p['m3_w1'] = w(ks[4], (16, dim * 2, 1, 1));   p['m3_b1'] = jnp.zeros((16,), jnp.float32)
    p['m3_g1'] = jnp.ones((16,), jnp.float32);    p['m3_be1'] = jnp.zeros((16,), jnp.float32)
    p['m3_w2'] = w(ks[5], (16, 16, 1, 1));        p['m3_b2'] = jnp.zeros((16,), jnp.float32)
    p['m3_g2'] = jnp.ones((16,), jnp.float32);    p['m3_be2'] = jnp.zeros((16,), jnp.float32)

    p['m4_w1'] = w(ks[6], (8, 16, 1));            p['m4_b1'] = jnp.zeros((8,), jnp.float32)
    p['m4_g1'] = jnp.ones((8,), jnp.float32);     p['m4_be1'] = jnp.zeros((8,), jnp.float32)
    p['m4_w2'] = w(ks[7], (1, 8, 1));             p['m4_b2'] = jnp.zeros((1,), jnp.float32)
    return p


def _batchnorm(x, gamma, beta, axes, eps=1e-5):
    # training-mode batchnorm (batch statistics), matching the torch module default
    mean = jnp.mean(x, axis=axes, keepdims=True)
    var = jnp.mean((x - mean) ** 2, axis=axes, keepdims=True)
    xh = (x - mean) / jnp.sqrt(var + eps)
    shape = [1] * x.ndim
    shape[1] = -1
    return xh * gamma.reshape(shape) + beta.reshape(shape)


def _bn_scale_shift(ssum, ssq, count, gamma, beta, eps=1e-5):
    """Fold batch-stat BN into a per-channel (scale, shift) from fused per-tile sum/sumsq."""
    s = jnp.sum(ssum, axis=(0, 1))[:, 0]          # (C,)
    q = jnp.sum(ssq, axis=(0, 1))[:, 0]
    mean = s / count
    var = jnp.maximum(q / count - mean * mean, 0.0)
    inv = gamma / jnp.sqrt(var + eps)
    return inv[:, None], (beta - mean * inv)[:, None]     # (C,1), (C,1)


def discriminator_forward(p, x, y):
    """x, y: (B, N, K, 3)  ->  inlier confidence (B, 1, N)."""
    B, N, K, _ = x.shape
    dim = p['m1_w1'].shape[0]
    count = float(B * K * N)
    tn = _pick_conv_tile(N, K, 2 * dim, _vmem_limit())

    def prep(inp):
        # (B, N, K, 3) -> (B, K, 3, N): channel-first per K row, N on lanes
        return jnp.transpose(inp, (0, 2, 3, 1))

    w1 = jnp.transpose(p['m1_w1'][:, :, :, 0], (2, 0, 1))                        # (3, dim, 3)
    w2 = jnp.transpose(p['m1_w2'][:, :, :, 0], (2, 0, 1)).astype(jnp.bfloat16)   # (3, 2dim, dim)

    def model1(inp):
        x0 = prep(inp)
        y1, s1, q1 = conv31_layer(x0, w1, p['m1_b1'], None, None, K=K, tn=tn,
                                  out_dtype=jnp.bfloat16, compute_dtype=jnp.float32)
        sc1, sh1 = _bn_scale_shift(s1, q1, count, p['m1_g1'], p['m1_be1'])
        y2, s2, q2 = conv31_layer(y1, w2, p['m1_b2'], sc1, sh1, K=K, tn=tn,
                                  out_dtype=jnp.bfloat16, compute_dtype=jnp.bfloat16)
        sc2, sh2 = _bn_scale_shift(s2, q2, count, p['m1_g2'], p['m1_be2'])
        return y2, sc2, sh2                                   # raw (B, K, 2dim, N) + affine

    x2raw, xsc, xsh = model1(x)
    y2raw, ysc, ysh = model1(y)

    # fused: activated difference + concatenated (m2 | m3) first 16-channel pw conv
    w_cat1 = jnp.concatenate([p['m2_w1'].reshape(16, 2 * dim),
                              p['m3_w1'].reshape(16, 2 * dim)], 0).astype(jnp.bfloat16)
    b_cat1 = jnp.concatenate([p['m2_b1'], p['m3_b1']], 0)
    a1, sa1, qa1 = head1_layer(x2raw, y2raw, xsc, xsh, ysc, ysh, w_cat1, b_cat1, K=K, tn=tn)
    g_cat1 = jnp.concatenate([p['m2_g1'], p['m3_g1']], 0)
    be_cat1 = jnp.concatenate([p['m2_be1'], p['m3_be1']], 0)
    sc_a1, sh_a1 = _bn_scale_shift(sa1, qa1, count, g_cat1, be_cat1)

    # block-diagonal (m2 | m3) second 16->16 pw conv
    w2a = p['m2_w2'].reshape(16, 16)
    w3a = p['m3_w2'].reshape(16, 16)
    z16 = jnp.zeros((16, 16), jnp.float32)
    w_cat2 = jnp.concatenate([jnp.concatenate([w2a, z16], 1),
                              jnp.concatenate([z16, w3a], 1)], 0)
    b_cat2 = jnp.concatenate([p['m2_b2'], p['m3_b2']], 0)
    a2, sa2, qa2 = pw_head_layer(a1, sc_a1, sh_a1, w_cat2, b_cat2, K=K, tn=tn)
    g_cat2 = jnp.concatenate([p['m2_g2'], p['m3_g2']], 0)
    be_cat2 = jnp.concatenate([p['m2_be2'], p['m3_be2']], 0)
    sc_a2, sh_a2 = _bn_scale_shift(sa2, qa2, count, g_cat2, be_cat2)

    # final BN+LeakyReLU of both heads + softmax over K + weighted sum over K
    fused = softk_layer(a2, sc_a2, sh_a2, K=K, tn=tn)          # (B, 16, N)

    # model4 is tiny (16 -> 8 -> 1): plain XLA
    h = jnp.einsum('oc,bcn->bon', p['m4_w1'].reshape(8, 16), fused) + p['m4_b1'][None, :, None]
    h = _leaky(_batchnorm(h, p['m4_g1'], p['m4_be1'], (0, 2)))
    out = jnp.einsum('oc,bcn->bon', p['m4_w2'].reshape(1, 8), h) + p['m4_b2'][None, :, None]
    return 1.0 - jnp.tanh(jnp.abs(out))                        # (B, 1, N)


# ---------------------------------------------------------------------------
# SVDHead pieces
# ---------------------------------------------------------------------------
def compute_rigid_transformation(src, src_corr, weight):
    src2, src_corr2, H = rigid_stats(src, src_corr, weight)
    # TODO(synk): batched 3x3 SVD / det have no Pallas primitive; done with jnp.linalg (XLA).
    u, _, vh = jnp.linalg.svd(H)
    v = jnp.swapaxes(vh, -1, -2)
    ut = jnp.swapaxes(u, -1, -2)
    r = jnp.matmul(v, ut)
    r_det = jnp.linalg.det(r)                                        # (B,)
    B = src.shape[0]
    diag = (jnp.zeros((B, 3, 3), jnp.float32)
            .at[:, 0, 0].set(1.0).at[:, 1, 1].set(1.0).at[:, 2, 2].set(r_det))
    R = jnp.matmul(jnp.matmul(v, diag), ut)
    t = jnp.matmul(-R, src2) + src_corr2                             # (B, 3, 1)
    return R, t


def get_keypoints(src, src_corr, weight, num_keypoints):
    B = src.shape[0]
    _, src_topk_idx = lax.top_k(weight, num_keypoints)               # (B, 1, nk)
    idx3 = jnp.broadcast_to(src_topk_idx, (B, 3, num_keypoints))
    src_keypoints = jnp.take_along_axis(src, idx3, axis=2)
    tgt_keypoints = jnp.take_along_axis(src_corr, idx3, axis=2)
    return src_topk_idx, src_keypoints, tgt_keypoints


def transform_point_cloud(pc, R, t):
    # TODO(synk): transform_point_cloud is imported externally in the reference; standard R@p + t.
    return jnp.matmul(R, pc) + t[:, :, None]


class SVDHeadPallas:
    def __init__(self, key):
        self.num_keypoints = 256
        self.nn_margin = 0.7
        self.disc_params = init_discriminator_params(key)
        # NOTE: the torch module also builds `self.fuse = Pointer()` but never calls it in forward.

    def __call__(self, src, tgt, src_embedding, tgt_embedding, src_idx, k,
                 src_knn, i, tgt_knn, src_idx1, idx2, k1):
        B, num_dims_src, N = src.shape
        M = tgt.shape[2]
        nk = self.num_keypoints

        # transposed source embedding used by both matching kernels (xx computed in-kernel)
        src_emb_t = jnp.transpose(src_embedding, (0, 2, 1))            # (B, N, C)

        # ---- score map (Pallas; distance map is not materialized in HBM) ----
        scores = pairwise_scores(src_emb_t, tgt_embedding)

        # ---- knn-consistency score refinement (index/gather glue in JAX) ----
        scores_flat = scores.reshape(B * N, M)
        sks = jnp.take(scores_flat, src_idx1, axis=0).reshape(B, N, k1, M)
        idx2_flat = idx2.reshape(B, M * k1)
        gathered = jnp.take_along_axis(sks, idx2_flat[:, None, None, :], axis=3)
        gathered = gathered.reshape(B, N, k1, M, k1)
        src_knn_scores = gathered[:, :, 1:, :, 1:].sum(-1).sum(2) / (k1 - 1)
        src_knn_scores = self.nn_margin - src_knn_scores

        # ---- refined matching map + pseudo correspondences + fused argmax (Pallas) ----
        refined_matching_map, src_corr, idx_corr = refine_and_correspond(
            src_emb_t, tgt_embedding, src_knn_scores, tgt)
        idx_tgt_corr = idx_corr[..., 0]                                    # (B, N) int32

        # ---- neighborhood difference features ----
        src_corr_t = jnp.transpose(src_corr, (0, 2, 1))                    # (B, N, 3)
        src_knn_corr = jnp.take(src_corr_t.reshape(B * N, 3), src_idx, axis=0).reshape(B, N, k, 3)
        knn_distance = src_corr_t[:, :, None, :] - src_knn_corr
        src_t = jnp.transpose(src, (0, 2, 1))
        src_knn_distance = src_t[:, :, None, :] - src_knn

        # ---- inlier confidence (Discriminator; fused Pallas conv/BN/LeakyReLU stack) ----
        weight = discriminator_forward(self.disc_params, knn_distance, src_knn_distance)

        # ---- rigid transform ----
        R, t = compute_rigid_transformation(src, src_corr, weight)

        # ---- keypoints ----
        src_topk_idx, src_keypoints, tgt_keypoints = get_keypoints(src, src_corr, weight, nk)

        # ---- spatial consistency loss ----
        one_hot_number = jnp.transpose(jax.nn.one_hot(idx_tgt_corr, M, dtype=jnp.float32),
                                       (0, 2, 1))                          # (B, M, N)
        src_keypoints_idx = jnp.broadcast_to(src_topk_idx, (B, M, nk))
        keypoints_one_hot = jnp.take_along_axis(one_hot_number, src_keypoints_idx, axis=2)
        keypoints_one_hot = keypoints_one_hot.transpose(0, 2, 1).reshape(B * nk, M)
        predicted = jnp.take_along_axis(jnp.transpose(refined_matching_map, (0, 2, 1)),
                                        src_keypoints_idx, axis=2)
        predicted = predicted.transpose(0, 2, 1).reshape(B * nk, M)
        loss_scl = jnp.mean(jnp.sum(-jnp.log(predicted + 1e-15) * keypoints_one_hot, axis=1))

        # ---- keypoint neighborhoods ----
        src_keypoints_idx2 = jnp.broadcast_to(src_topk_idx[..., None], (B, 3, nk, k))
        tgt_keypoints_knn = jnp.take_along_axis(jnp.transpose(knn_distance, (0, 3, 1, 2)),
                                                src_keypoints_idx2, axis=2)

        src_transformed = transform_point_cloud(src, R, t.reshape(B, 3))
        src_tr_t = jnp.transpose(src_transformed, (0, 2, 1))
        src_tr_knn_corr = jnp.take(src_tr_t.reshape(B * N, 3), src_idx, axis=0).reshape(B, N, k, 3)
        knn_distance2 = src_tr_t[:, :, None, :] - src_tr_knn_corr
        src_keypoints_knn = jnp.take_along_axis(jnp.transpose(knn_distance2, (0, 3, 1, 2)),
                                                src_keypoints_idx2, axis=2)

        return (R, t.reshape(B, 3), src_keypoints, tgt_keypoints,
                src_keypoints_knn, tgt_keypoints_knn, loss_scl)


# ---------------------------------------------------------------------------
if __name__ == "__main__":
    key = jax.random.PRNGKey(0)
    keys = jax.random.split(key, 10)

    B, N, M, C, K, K1 = 2, 256, 128, 32, 8, 4   # N >= num_keypoints (=256) as the module requires

    src = jax.random.normal(keys[0], (B, 3, N), jnp.float32)
    tgt = jax.random.normal(keys[1], (B, 3, M), jnp.float32)
    src_embedding = jax.random.normal(keys[2], (B, C, N), jnp.float32)
    tgt_embedding = jax.random.normal(keys[3], (B, C, M), jnp.float32)

    base_src = (jnp.arange(B, dtype=jnp.int32) * N)[:, None, None]
    base_tgt = (jnp.arange(B, dtype=jnp.int32) * M)[:, None, None]
    src_idx = (base_src + jax.random.randint(keys[4], (B, N, K), 0, N)).reshape(-1)    # (B*N*K,)
    src_idx1 = (base_src + jax.random.randint(keys[5], (B, N, K1), 0, N)).reshape(-1)  # (B*N*K1,)
    idx2 = jax.random.randint(keys[6], (B, M, K1), 0, M)                               # (B, M, K1)

    src_knn = jnp.take(jnp.transpose(src, (0, 2, 1)).reshape(B * N, 3),
                       src_idx, axis=0).reshape(B, N, K, 3)
    tgt_knn_idx = (base_tgt + jax.random.randint(keys[7], (B, M, K), 0, M)).reshape(-1)
    tgt_knn = jnp.take(jnp.transpose(tgt, (0, 2, 1)).reshape(B * M, 3),
                       tgt_knn_idx, axis=0).reshape(B, M, K, 3)

    head = SVDHeadPallas(keys[8])
    outputs = head(src, tgt, src_embedding, tgt_embedding, src_idx, K,
                   src_knn, 0, tgt_knn, src_idx1, idx2, K1)
    outputs = jax.block_until_ready(outputs)
    print("KERNEL_OK")
</pallas_src>

<mosaic_0001>
module attributes {stable_mosaic.version = 11 : i64} {
  func.func @_scores_kernel(%arg0: i32, %arg1: i32, %arg2: memref<1x256x32xf32, #tpu.memory_space<vmem>>, %arg3: memref<1x32x128xf32, #tpu.memory_space<vmem>>, %arg4: memref<1x256x128xf32, #tpu.memory_space<vmem>>) attributes {dimension_semantics = [#tpu.dimension_semantics<parallel>, #tpu.dimension_semantics<parallel>], iteration_bounds = array<i64: 2, 1>, scalar_prefetch = 0 : i64, scratch_operands = 0 : i64, tpu.core_type = #tpu.core_type<tc>, window_params = [{transform_indices = @transform_0, window_bounds = array<i64: 1, 256, 32>}, {transform_indices = @transform_1, window_bounds = array<i64: 1, 32, 128>}, {transform_indices = @transform_2, window_bounds = array<i64: 1, 256, 128>}]} {
    %c0 = arith.constant 0 : index
    %c0_0 = arith.constant 0 : index
    %c0_1 = arith.constant 0 : index
    %0 = vector.load %arg2[%c0, %c0_0, %c0_1] : memref<1x256x32xf32, #tpu.memory_space<vmem>>, vector<1x256x32xf32>
    %1 = vector.shape_cast %0 : vector<1x256x32xf32> to vector<256x32xf32>
    %c0_2 = arith.constant 0 : index
    %c0_3 = arith.constant 0 : index
    %c0_4 = arith.constant 0 : index
    %2 = vector.load %arg3[%c0_2, %c0_3, %c0_4] : memref<1x32x128xf32, #tpu.memory_space<vmem>>, vector<1x32x128xf32>
    %3 = vector.shape_cast %2 : vector<1x32x128xf32> to vector<32x128xf32>
    %4 = arith.mulf %1, %1 : vector<256x32xf32>
    %cst = arith.constant dense<0.000000e+00> : vector<256xf32>
    %5 = vector.multi_reduction <add>, %4, %cst [1] : vector<256x32xf32> to vector<256xf32>
    %6 = vector.shape_cast %5 : vector<256xf32> to vector<256x1xf32>
    %7 = arith.mulf %3, %3 : vector<32x128xf32>
    %cst_5 = arith.constant dense<0.000000e+00> : vector<128xf32>
    %8 = vector.multi_reduction <add>, %7, %cst_5 [0] : vector<32x128xf32> to vector<128xf32>
    %9 = vector.shape_cast %8 : vector<128xf32> to vector<1x128xf32>
    %cst_6 = arith.constant dense<0.000000e+00> : vector<256x128xf32>
    %10 = tpu.matmul %1, %3, %cst_6 {dimension_numbers = #tpu.dot_dimension_numbers<[1], [0], [0], [1], [0, 0, 1, 1], [], []>} : vector<256x32xf32>, vector<32x128xf32>, vector<256x128xf32> -> vector<256x128xf32>
    %cst_7 = arith.constant -2.000000e+00 : f32
    %11 = vector.broadcast %cst_7 : f32 to vector<256x128xf32>
    %12 = arith.mulf %11, %10 : vector<256x128xf32>
    %13 = vector.broadcast %6 : vector<256x1xf32> to vector<256x128xf32>
    %14 = arith.addf %13, %12 : vector<256x128xf32>
    %15 = vector.broadcast %9 : vector<1x128xf32> to vector<256x128xf32>
    %16 = arith.addf %14, %15 : vector<256x128xf32>
    %cst_8 = arith.constant 0.000000e+00 : f32
    %17 = vector.broadcast %cst_8 : f32 to vector<256x128xf32>
    %18 = arith.maximumf %16, %17 : vector<256x128xf32>
    %cst_9 = arith.constant 0.000000e+00 : f32
    %19 = vector.broadcast %cst_9 : f32 to vector<256x128xf32>
    %20 = arith.cmpf ole, %18, %19 : vector<256x128xf32>
    %21 = arith.extui %20 : vector<256x128xi1> to vector<256x128xi32>
    %22 = arith.sitofp %21 : vector<256x128xi32> to vector<256x128xf32>
    %cst_10 = arith.constant 1.000000e-16 : f32
    %23 = vector.broadcast %cst_10 : f32 to vector<256x128xf32>
    %24 = arith.mulf %22, %23 : vector<256x128xf32>
    %25 = arith.addf %18, %24 : vector<256x128xf32>
    %26 = math.sqrt %25 : vector<256x128xf32>
    %cst_11 = arith.constant 1.000000e+00 : f32
    %27 = vector.broadcast %cst_11 : f32 to vector<256x128xf32>
    %28 = arith.subf %27, %22 : vector<256x128xf32>
    %29 = arith.mulf %26, %28 : vector<256x128xf32>
    %cst_12 = arith.constant 0.000000e+00 : f32
    %30 = vector.broadcast %cst_12 : f32 to vector<256x128xf32>
    %31 = arith.subf %30, %29 : vector<256x128xf32>
    %cst_13 = arith.constant dense<0xFF800000> : vector<256xf32>
    %32 = vector.multi_reduction <maximumf>, %31, %cst_13 [1] : vector<256x128xf32> to vector<256xf32>
    %33 = vector.shape_cast %32 : vector<256xf32> to vector<256x1xf32>
    %34 = vector.broadcast %33 : vector<256x1xf32> to vector<256x128xf32>
    %35 = arith.subf %31, %34 : vector<256x128xf32>
    %36 = math.exp %35 : vector<256x128xf32>
    %cst_14 = arith.constant dense<0.000000e+00> : vector<256xf32>
    %37 = vector.multi_reduction <add>, %36, %cst_14 [1] : vector<256x128xf32> to vector<256xf32>
    %38 = vector.shape_cast %37 : vector<256xf32> to vector<256x1xf32>
    %39 = tpu.reciprocal %38 {approx = true} : vector<256x1xf32> -> vector<256x1xf32>
    %40 = vector.broadcast %39 : vector<256x1xf32> to vector<256x128xf32>
    %41 = arith.mulf %36, %40 : vector<256x128xf32>
    %c0_15 = arith.constant 0 : index
    %c0_16 = arith.constant 0 : index
    %c0_17 = arith.constant 0 : index
    %42 = vector.load %arg4[%c0_15, %c0_16, %c0_17] : memref<1x256x128xf32, #tpu.memory_space<vmem>>, vector<1x256x128xf32>
    %43 = vector.shape_cast %42 : vector<1x256x128xf32> to vector<256x128xf32>
    %44 = vector.shape_cast %41 : vector<256x128xf32> to vector<1x256x128xf32>
    tpu.vector_store %arg4[%c0_15, %c0_16, %c0_17], %44 {strides = array<i32>} : memref<1x256x128xf32, #tpu.memory_space<vmem>>, vector<1x256x128xf32>,
    return
  }
  func.func @transform_0(%arg0: i32, %arg1: i32) -> (i32, i32, i32) {
    %c0_i32 = arith.constant 0 : i32
    %c0_i32_0 = arith.constant 0 : i32
    return %arg0, %arg1, %c0_i32 : i32, i32, i32
  }
  func.func @transform_1(%arg0: i32, %arg1: i32) -> (i32, i32, i32) {
    %c0_i32 = arith.constant 0 : i32
    %c0_i32_0 = arith.constant 0 : i32
    %c0_i32_1 = arith.constant 0 : i32
    return %arg0, %c0_i32, %c0_i32_0 : i32, i32, i32
  }
  func.func @transform_2(%arg0: i32, %arg1: i32) -> (i32, i32, i32) {
    %c0_i32 = arith.constant 0 : i32
    %c0_i32_0 = arith.constant 0 : i32
    return %arg0, %arg1, %c0_i32 : i32, i32, i32
  }
}

</mosaic_0001>

<bundles_post_ra>
// kernel: tpu_custom_call.1
= control target key start
LH: loop header
LB: loop body
LE: loop exit
PB: predicated region body
PF: predicated region fallthrough
CT: control target
= control target key end

     0   :  { %7 = vsyncpa [#allocation3], 0  ;;  %s3750_s0 = inlined_call_operand.vmem [shape: f32[2,256,32], index: 0, kind: input, shape index: {}]   ;;  %s3751_s1 = inlined_call_operand.vmem [shape: f32[2,32,128], index: 1, kind: input, shape index: {}]   ;;  %s3752_s2 = inlined_call_operand.hbm [shape: f32[2,256,128], index: 2, kind: output, shape index: {}]  }
   0x1   :  { %9 = vsyncpa [#allocation3 + $0x1], 0  ;;  %s2262_s9 = smov 0   ;;  %s2264_s10 = smov 0  }
   0x2   :  { %s2266_s11 = smov 0   ;;  %s2268_s12 = smov 0  }
   0x3   :  { %s2270_s13 = smov 0   ;;  %s2272_s14 = smov 0  }
   0x4 LB: > { %s1727_s15 = sadd.s32 4294967295, %s2241_s14   ;;  %s1728_s16 = sadd.s32 4294967294, %s2241_s14   ;;  %s2241_s14 = sphi %s2272_s14, %s15_s14   ;;  %s2237_s13 = sphi %s2270_s13, %s3853_s13   ;;  %s2233_s12 = sphi %s2268_s12, %s3852_s12   ;;  %s2229_s11 = sphi %s2266_s11, %s3851_s11   ;;  %s2225_s10 = sphi %s2264_s10, %s3850_s10   ;;  %s2221_s9 = sphi %s2262_s9, %s3849_s9  }
   0x5   : > { %s27_s17 = sadd.s32 1, %s2237_s13  ;;  %s90_s18 = sadd.s32 1, %s2229_s11 }
   0x6   : > { %p29_p0 = scmp.ge.s32.totalorder %s27_s17, 2  ;;  %p100_p1 = scmp.ne.s32.totalorder %s2229_s11, %s2225_s10 }
   0x7   : > { %p101_p2 = scmp.eq.s32.totalorder %s1727_s15, 1  ;;  %p106_p3 = scmp.ne.s32.totalorder %s2225_s10, %s2221_s9 }
   0x8   : > { %s3855_s17 = smov (%p29_p0, %s27_s17), 0  ;;  %p107_p5 = scmp.eq.s32.totalorder %s1728_s16, 1 }
   0x9   : > { %p2302_p4 = por %p101_p2, %p100_p1  ;;  %s85_s20 = ssub.s32 %s2237_s13, %s3855_s17 }
   0xa   : > { %p1731_p6 = scmp.ge.s32.totalorder %s2241_s14, 1  ;;  %p88_p7 = scmp.eq.s32.totalorder %s85_s20, 0 }
   0xb   : > { %p2309_p8 = por %p107_p5, %p106_p3  ;;  %p146_p9 = scmp.lt.s32.totalorder %s2241_s14, 3 }
   0xc   : > { %s2315_s22 = scalar_select %p88_p7, %s2229_s11, %s90_s18  }
   0xd   : > { %p147_p10 = pnand %p1731_p6, %p146_p9 }
   0xf   : > { %150 = sbr.rel (%p147_p10) target bundleno = 739 (0x2e3), region = 28 }
  0x16   : > { %p178_p11 = scmp.lt.s32.totalorder %s2233_s12, 1  ;;  %vm261_vm0 = vcmask 261120   ;;  %s174_s4 = sand.u32 1, %s2225_s10  }
  0x17   : > { %s1732_s5 = sshll.u32 %s174_s4, 8  ;;  %s1808_s7 = sshll.u32 %s2233_s12, 12 }
  0x18   : > { %s179_s23 = scalar_select %p178_p11, %s2233_s12, 1 }
  0x19   : > { %s3628_s6 = scalar_lea.vmem [#allocation2], %s1732_s5  ;;  %s3695_s18 = scalar_lea.hbm %s3752_s2, %s1808_s7 }
  0x1a   : > { %s1806_s24 = sshll.u32 %s179_s23, 8  ;;  %s1807_s25 = sshll.u32 %s179_s23, 5 }
  0x1b   : > { %s2322_s28 = scalar_lea.vmem %s3750_s0, %s1806_s24  ;;  %s191_s3 = scalar_lea.vmem %s3751_s1, %s1807_s25 }
  0x1c   : > { %v225_v0 = vld [vmem:[%s191_s3] sm:$0xff]  ;;  %v226_v1 = vld [vmem:[%s191_s3 + $0x8] sm:$0xff]  ;;  %v227_v2 = vld [vmem:[%s191_s3 + $0x10] sm:$0xff]  ;;  %s1636_s8 = sshll.u32 %s3628_s6, 4  ;;  %s3704_s12 = scalar_lea.sflag [#allocation3], %s174_s4  ;;  %s3697_s8 = int_to_ptr.vmem [resolvable:$true] %s1636_s8 }
  0x1d   : > { %v358_v3 = vmul.f32 %v225_v0, %v225_v0  ;;  %v359_v4 = vmul.f32 %v226_v1, %v226_v1  ;;  %v1901_v5 = vpack.c.bf16 %v226_v1, %v225_v0  ;;  %v228_v6 = vld [vmem:[%s191_s3 + $0x18] sm:$0xff]  ;;  %v360_v7 = vmul.f32 %v227_v2, %v227_v2  ;;  %v193_v8 = vld [vmem:[%s2322_s28] sm:$0xff]  ;;  %v195_v11 = vld [vmem:[%s2322_s28 + $0x10] sm:$0xff]  ;;  %s2163_s20 = scalar_lea.vmem %s3697_s8, 4096  ;;  %s2244_s23 = smov [#allocation2]  }
  0x1e   : > { %v1905_v9 = vpack.c.bf16 %v228_v6, %v227_v2  ;;  %v229_v10 = vmul.f32 %v193_v8, %v193_v8  ;;  %1853 = vmatprep.mubr.msk.f32.mxu0 %vm261_vm0, %v193_v8  ;;  %v361_v13 = vmul.f32 %v228_v6, %v228_v6  ;;  %v2331_v14 = vld [vmem:[%s2322_s28 + $0x80] sm:$0xff]  ;;  %v196_v15 = vld [vmem:[%s2322_s28 + $0x18] sm:$0xff]  ;;  %v231_v16 = vmul.f32 %v195_v11, %v195_v11  ;;  %v194_v20 = vld [vmem:[%s2322_s28 + $0x8] sm:$0xff]  ;;  %p2164_p12 = scmp.ne.s32.totalorder %s3697_s8, %s2163_s20  ;;  %s2167_s24 = sshll.u32 %s2244_s23, 4  ;;  %s2168_s24 = int_to_ptr.vmem [resolvable:$false] %s2167_s24 }
  0x1f   : > { %v362_v12 = vadd.f32 %v359_v4, %v358_v3  ;;  %1902 = vmatprep.subr.bf16.mxu0 %v1901_v5  ;;  %1909 = vmatprep.subr.bf16.mxu1 %v1901_v5  ;;  %v232_v18 = vmul.f32 %v196_v15, %v196_v15  ;;  %v198_v22 = vld [vmem:[%s2322_s28 + $0x28] sm:$0xff]  ;;  %v230_v23 = vmul.f32 %v194_v20, %v194_v20  ;;  %v2347_v28 = vld [vmem:[%s2322_s28 + $0x90] sm:$0xff]  ;;  %v197_v29 = vld [vmem:[%s2322_s28 + $0x20] sm:$0xff]  ;;  %s2169_s25 = scalar_lea.vmem %s2168_s24, 8192  ;;  %p2170_p1 = scmp.lt.s32.totalorder %s3697_s8, %s2168_s24 }
  0x20   : > { %1904 = vmatpush3.bf16.msra.mxu0 %v1901_v5  ;;  %1911 = vmatpush3.bf16.msra.mxu1 %v1901_v5  ;;  %v262_v17 = vsel %vm261_vm0, %v229_v10, 0.0  ;;  %v268_v21 = vsel %vm261_vm0, %v231_v16, 0.0  ;;  %v234_v26 = vmul.f32 %v198_v22, %v198_v22  ;;  %v2344_v27 = vld [vmem:[%s2322_s28 + $0x88] sm:$0xff]  ;;  %v200_v30 = vld [vmem:[%s2322_s28 + $0x38] sm:$0xff]  ;;  %v233_v32 = vmul.f32 %v197_v29, %v197_v29  ;;  %v2363_v36 = vld [vmem:[%s2322_s28 + $0xa0] sm:$0xff]  ;;  %p2165_p13 = pnand %p2164_p12, %p2302_p4  ;;  %p2171_p2 = scmp.lt.s32.totalorder %s2169_s25, %s2163_s20 }
  0x21   : > { %v363_v19 = vadd.f32 %v362_v12, %v360_v7  ;;  %1906 = vmatprep.subr.bf16.mxu0 %v1905_v9  ;;  %1910 = vmatprep.subr.bf16.mxu1 %v1905_v9  ;;  %v271_v25 = vsel %vm261_vm0, %v232_v18, 0.0  ;;  %v265_v31 = vsel %vm261_vm0, %v230_v23, 0.0  ;;  %v236_v34 = vmul.f32 %v200_v30, %v200_v30  ;;  %v2360_v35 = vld [vmem:[%s2322_s28 + $0x98] sm:$0xff]  ;;  %v199_v37 = vld [vmem:[%s2322_s28 + $0x30] sm:$0xff]  ;;  %v202_v38 = vld [vmem:[%s2322_s28 + $0x48] sm:$0xff] }
  0x22   : > { %1877 = vmatprep.mubr.msk.f32.mxu1 %vm261_vm0, %v2331_v14  ;;  %269 = vadd.xlane.f32.xlu1 %v268_v21  ;;  %v277_v33 = vsel %vm261_vm0, %v234_v26, 0.0  ;;  %v274_v39 = vsel %vm261_vm0, %v233_v32, 0.0  ;;  %v235_v40 = vmul.f32 %v199_v37, %v199_v37  ;;  %v238_v42 = vmul.f32 %v202_v38, %v202_v38  ;;  %v2376_v43 = vld [vmem:[%s2322_s28 + $0xa8] sm:$0xff]  ;;  %v2379_v44 = vld [vmem:[%s2322_s28 + $0xb0] sm:$0xff]  ;;  %v201_v45 = vld [vmem:[%s2322_s28 + $0x40] sm:$0xff]  ;;  %p2166_p0 = pneg %p2165_p13  ;;  %p2172_p3 = por %p2171_p2, %p2170_p1 }
  0x23   : > { %v2340_v24 = vadd.f32 %v363_v19, %v361_v13  ;;  %263 = vadd.xlane.f32.xlu0 %v262_v17  ;;  %v283_v41 = vsel %vm261_vm0, %v236_v34, 0.0  ;;  %v204_v46 = vld [vmem:[%s2322_s28 + $0x58] sm:$0xff]  ;;  %v237_v48 = vmul.f32 %v201_v45, %v201_v45  ;;  %v2395_v52 = vld [vmem:[%s2322_s28 + $0xc0] sm:$0xff]  ;;  %v203_v53 = vld [vmem:[%s2322_s28 + $0x50] sm:$0xff]  ;;  %v245_v12 = vmul.f32 %v2331_v14, %v2331_v14 }
  0x24   : > { %1908 = vmatpush3.bf16.msra.mxu0 %v1905_v9  ;;  %1912 = vmatpush3.bf16.msra.mxu1 %v1905_v9  ;;  %v280_v47 = vsel %vm261_vm0, %v235_v40, 0.0  ;;  %v289_v49 = vsel %vm261_vm0, %v238_v42, 0.0  ;;  %v240_v50 = vmul.f32 %v204_v46, %v204_v46  ;;  %v2392_v51 = vld [vmem:[%s2322_s28 + $0xb8] sm:$0xff]  ;;  %v206_v54 = vld [vmem:[%s2322_s28 + $0x68] sm:$0xff]  ;;  %v239_v56 = vmul.f32 %v203_v53, %v203_v53  ;;  %v205_v60 = vld [vmem:[%s2322_s28 + $0x60] sm:$0xff]  ;;  %p2173_p5 = pnand %p2172_p3, %p2166_p0 }
  0x25   : > { %v286_v55 = vsel %vm261_vm0, %v237_v48, 0.0  ;;  %v242_v58 = vmul.f32 %v206_v54, %v206_v54  ;;  %v218_v59 = vld [vmem:[%s2322_s28 + $0xc8] sm:$0xff]  ;;  %v2410_v61 = vld [vmem:[%s2322_s28 + $0xd0] sm:$0xff]  ;;  %v208_v62 = vld [vmem:[%s2322_s28 + $0x78] sm:$0xff]  ;;  %v241_v0 = vmul.f32 %v205_v60, %v205_v60  ;;  %v246_v9 = vmul.f32 %v2344_v27, %v2344_v27 }
  0x26   : > { %272 = vadd.xlane.f32.xlu1 %v271_v25  ;;  %v295_v57 = vsel %vm261_vm0, %v240_v50, 0.0  ;;  %v292_v63 = vsel %vm261_vm0, %v239_v56, 0.0  ;;  %v244_v2 = vmul.f32 %v208_v62, %v208_v62  ;;  %v220_v3 = vld [vmem:[%s2322_s28 + $0xd8] sm:$0xff]  ;;  %v207_v4 = vld [vmem:[%s2322_s28 + $0x70] sm:$0xff]  ;;  %v221_v5 = vld [vmem:[%s2322_s28 + $0xe0] sm:$0xff]  ;;  %v248_v16 = vmul.f32 %v2360_v35, %v2360_v35 }
  0x27   : > { %1854 = vmatmul.mubr.msk.f32.vlgmr.msra.gmra.mrb[0].mxu0 %vm261_vm0, %v194_v20  ;;  %1878 = vmatmul.mubr.msk.f32.vlgmr.msra.gmra.mrb[0].mxu1 %vm261_vm0, %v2344_v27  ;;  %v301_v1 = vsel %vm261_vm0, %v242_v58, 0.0  ;;  %v298_v6 = vsel %vm261_vm0, %v241_v0, 0.0  ;;  %v243_v7 = vmul.f32 %v207_v4, %v207_v4  ;;  %v222_v10 = vld [vmem:[%s2322_s28 + $0xe8] sm:$0xff]  ;;  %v224_v17 = vld [vmem:[%s2322_s28 + $0xf8] sm:$0xff]  ;;  %v310_v14 = vsel %vm261_vm0, %v245_v12, 0.0 }
  0x28   : > { %1856 = vmatprep.mubr.msk.f32.mxu0 %vm261_vm0, %v195_v11  ;;  %1880 = vmatprep.mubr.msk.f32.mxu1 %vm261_vm0, %v2347_v28  ;;  %v307_v8 = vsel %vm261_vm0, %v244_v2, 0.0  ;;  %v223_v11 = vld [vmem:[%s2322_s28 + $0xf0] sm:$0xff]  ;;  %v247_v18 = vmul.f32 %v2347_v28, %v2347_v28  ;;  %v319_v19 = vsel %vm261_vm0, %v248_v16, 0.0  ;;  %v250_v20 = vmul.f32 %v2376_v43, %v2376_v43 }
  0x29   : > { %266 = vadd.xlane.f32.xlu0 %v265_v31  ;;  %v304_v13 = vsel %vm261_vm0, %v243_v7, 0.0  ;;  %v252_v25 = vmul.f32 %v2392_v51, %v2392_v51  ;;  %v251_v27 = vmul.f32 %v2379_v44, %v2379_v44  ;;  %v253_v31 = vmul.f32 %v2395_v52, %v2395_v52 }
  0x2a   : > { %278 = vadd.xlane.f32.xlu1 %v277_v33  ;;  %v316_v21 = vsel %vm261_vm0, %v247_v18, 0.0  ;;  %v325_v23 = vsel %vm261_vm0, %v250_v20, 0.0  ;;  %v256_v33 = vmul.f32 %v220_v3, %v220_v3  ;;  %v365_v58 = vrot.slane %v2340_v24, 4 }
  0x2b   : > { %1857 = vmatmul.mubr.msk.f32.gmra.mrb[2].mxu0 %vm261_vm0, %v196_v15  ;;  %1881 = vmatmul.mubr.msk.f32.gmra.mrb[2].mxu1 %vm261_vm0, %v2360_v35  ;;  %v313_v15 = vsel %vm261_vm0, %v246_v9, 0.0  ;;  %v331_v28 = vsel %vm261_vm0, %v252_v25, 0.0  ;;  %v334_v34 = vsel %vm261_vm0, %v253_v31, 0.0  ;;  %v255_v35 = vmul.f32 %v2410_v61, %v2410_v61 }
  0x2c   : > { %1859 = vmatprep.mubr.msk.f32.mxu0 %vm261_vm0, %v197_v29  ;;  %1883 = vmatprep.mubr.msk.f32.mxu1 %vm261_vm0, %v2363_v36  ;;  %v254_v29 = vmul.f32 %v218_v59, %v218_v59 }
  0x2d   : > { %275 = vadd.xlane.f32.xlu0 %v274_v39  ;;  %v257_v39 = vmul.f32 %v221_v5, %v221_v5 }
  0x2e   : > { %284 = vadd.xlane.f32.xlu1 %v283_v41  ;;  %v337_v32 = vsel %vm261_vm0, %v254_v29, 0.0  ;;  %v260_v41 = vmul.f32 %v224_v17, %v224_v17 }
  0x2f   : > { %1860 = vmatmul.mubr.msk.f32.gmra.mrb[4].mxu0 %vm261_vm0, %v198_v22  ;;  %1884 = vmatmul.mubr.msk.f32.gmra.mrb[4].mxu1 %vm261_vm0, %v2376_v43  ;;  %v249_v22 = vmul.f32 %v2363_v36, %v2363_v36  ;;  %v343_v36 = vsel %vm261_vm0, %v256_v33, 0.0  ;;  %v346_v42 = vsel %vm261_vm0, %v257_v39, 0.0  ;;  %v259_v43 = vmul.f32 %v223_v11, %v223_v11 }
  0x30   : > { %1862 = vmatprep.mubr.msk.f32.mxu0 %vm261_vm0, %v199_v37  ;;  %1886 = vmatprep.mubr.msk.f32.mxu1 %vm261_vm0, %v2379_v44  ;;  %v258_v37 = vmul.f32 %v222_v10, %v222_v10  ;;  %v355_v44 = vsel %vm261_vm0, %v260_v41, 0.0 }
  0x31   : > { %281 = vadd.xlane.f32.xlu0 %v280_v47  ;;  %v322_v26 = vsel %vm261_vm0, %v249_v22, 0.0 }
  0x32   : > { %290 = vadd.xlane.f32.xlu1 %v289_v49  ;;  %v349_v40 = vsel %vm261_vm0, %v258_v37, 0.0 }
  0x33   : > { %1863 = vmatmul.mubr.msk.f32.gmra.mrb[6].mxu0 %vm261_vm0, %v200_v30  ;;  %1887 = vmatmul.mubr.msk.f32.gmra.mrb[6].mxu1 %vm261_vm0, %v2392_v51  ;;  %v328_v30 = vsel %vm261_vm0, %v251_v27, 0.0 }
  0x34   : > { %1865 = vmatprep.mubr.msk.f32.mxu0 %vm261_vm0, %v201_v45  ;;  %1889 = vmatprep.mubr.msk.f32.mxu1 %vm261_vm0, %v2395_v52  ;;  %v352_v45 = vsel %vm261_vm0, %v259_v43, 0.0 }
  0x35   : > { %287 = vadd.xlane.f32.xlu0 %v286_v55 }
  0x36   : > { %296 = vadd.xlane.f32.xlu1 %v295_v57 }
  0x37   : > { %1866 = vmatmul.mubr.msk.f32.gmra.mrb[8].mxu0 %vm261_vm0, %v202_v38  ;;  %1890 = vmatmul.mubr.msk.f32.gmra.mrb[8].mxu1 %vm261_vm0, %v218_v59  ;;  %v340_v38 = vsel %vm261_vm0, %v255_v35, 0.0 }
  0x38   : > { %1868 = vmatprep.mubr.msk.f32.mxu0 %vm261_vm0, %v203_v53  ;;  %1892 = vmatprep.mubr.msk.f32.mxu1 %vm261_vm0, %v2410_v61 }
  0x39   : > { %293 = vadd.xlane.f32.xlu0 %v292_v63 }
  0x3a   : > { %302 = vadd.xlane.f32.xlu1 %v301_v1 }
  0x3b   : > { %1869 = vmatmul.mubr.msk.f32.gmra.mrb[10].mxu0 %vm261_vm0, %v204_v46  ;;  %1893 = vmatmul.mubr.msk.f32.gmra.mrb[10].mxu1 %vm261_vm0, %v220_v3 }
  0x3c   : > { %1871 = vmatprep.mubr.msk.f32.mxu0 %vm261_vm0, %v205_v60  ;;  %1895 = vmatprep.mubr.msk.f32.mxu1 %vm261_vm0, %v221_v5  ;;  %v366_v60 = vadd.f32 %v365_v58, %v2340_v24 }
  0x3d   : > { %299 = vadd.xlane.f32.xlu0 %v298_v6 }
  0x3e   : > { %308 = vadd.xlane.f32.xlu1 %v307_v8  ;;  %v367_v63 = vrot.slane %v366_v60, 2 }
  0x3f   : > { %1872 = vmatmul.mubr.msk.f32.gmra.mrb[12].mxu0 %vm261_vm0, %v206_v54  ;;  %1896 = vmatmul.mubr.msk.f32.gmra.mrb[12].mxu1 %vm261_vm0, %v222_v10 }
  0x40   : > { %1874 = vmatprep.mubr.msk.f32.mxu0 %vm261_vm0, %v207_v4  ;;  %1898 = vmatprep.mubr.msk.f32.mxu1 %vm261_vm0, %v223_v11  ;;  %v368_v1 = vadd.f32 %v367_v63, %v366_v60 }
  0x41   : > { %305 = vadd.xlane.f32.xlu0 %v304_v13 }
  0x42   : > { %314 = vadd.xlane.f32.xlu1 %v313_v15  ;;  %v369_v3 = vrot.slane %v368_v1, 1 }
  0x43   : > { %1875 = vmatmul.mubr.msk.f32.gmra.mrb[14].mxu0 %vm261_vm0, %v208_v62  ;;  %1899 = vmatmul.mubr.msk.f32.gmra.mrb[14].mxu1 %vm261_vm0, %v224_v17 }
  0x44   : > { %v2501_v8 = vadd.f32 %v369_v3, %v368_v1 }
  0x45   : > { %311 = vadd.xlane.f32.xlu0 %v310_v14 }
  0x46   : > { %320 = vadd.xlane.f32.xlu1 %v319_v19 }
  0x49   : > { %317 = vadd.xlane.f32.xlu0 %v316_v21 }
  0x4a   : > { %326 = vadd.xlane.f32.xlu1 %v325_v23 }
  0x4d   : > { %323 = vadd.xlane.f32.xlu0 %v322_v26 }
  0x4e   : > { %332 = vadd.xlane.f32.xlu1 %v331_v28 }
  0x51   : > { %329 = vadd.xlane.f32.xlu0 %v328_v30 }
  0x52   : > { %338 = vadd.xlane.f32.xlu1 %v337_v32 }
  0x55   : > { %335 = vadd.xlane.f32.xlu0 %v334_v34 }
  0x56   : > { %344 = vadd.xlane.f32.xlu1 %v343_v36 }
  0x59   : > { %341 = vadd.xlane.f32.xlu0 %v340_v38 }
  0x5a   : > { %350 = vadd.xlane.f32.xlu1 %v349_v40 }
  0x5d   : > { %347 = vadd.xlane.f32.xlu0 %v346_v42 }
  0x5e   : > { %356 = vadd.xlane.f32.xlu1 %v355_v44 }
  0x61   : > { %353 = vadd.xlane.f32.xlu0 %v352_v45 }
  0xaf   : > { %v270_v46 = vpop.xlane.xlu1 %269 }
  0xb0   : > { %v264_v47 = vpop.xlane.xlu0 %263 }
  0xb3   : > { %v273_v48 = vpop.xlane.xlu1 %272 }
  0xb6   : > { %v267_v49 = vpop.xlane.xlu0 %266 }
  0xb7   : > { %v2475_v50 = vpop.xlane.xlu1 %278 }
  0xba   : > { %v2477_v51 = vpop.xlane.xlu0 %275 }
  0xbb   : > { %v2479_v52 = vpop.xlane.xlu1 %284 }
  0xbe   : > { %v2481_v53 = vpop.xlane.xlu0 %281 }
  0xbf   : > { %v2483_v54 = vpop.xlane.xlu1 %290 }
  0xc2   : > { %v2485_v55 = vpop.xlane.xlu0 %287 }
  0xc3   : > { %v2487_v56 = vpop.xlane.xlu1 %296 }
  0xc6   : > { %v2489_v57 = vpop.xlane.xlu0 %293 }
  0xc7   : > { %v2492_v59 = vpop.xlane.xlu1 %302 }
  0xca   : > { %v2495_v61 = vpop.xlane.xlu0 %299 }
  0xcb   : > { %v2497_v62 = vpop.xlane.xlu1 %308 }
  0xce   : > { %v2499_v0 = vpop.xlane.xlu0 %305 }
  0xcf   : > { %v315_v2 = vpop.xlane.xlu1 %314 }
  0xd2   : > { %v312_v4 = vpop.xlane.xlu0 %311 }
  0xd3   : > { %v321_v5 = vpop.xlane.xlu1 %320 }
  0xd6   : > { %v318_v17 = vpop.xlane.xlu0 %317 }
  0xd7   : > { %v327_v34 = vpop.xlane.xlu1 %326 }
  0xfa   : > { %v1855_v6 = vpop.f32.mrb[0].mxu0  ;;  %v1879_v7 = vpop.f32.mrb[0].mxu1 }
  0xfb   : > { %v693_v9 = vmul.f32 -2.0, %v1855_v6  ;;  %v709_v10 = vmul.f32 -2.0, %v1879_v7  ;;  %v533_v11 = vpop.f32.mrb[1].mxu0  ;;  %v613_v24 = vpop.f32.mrb[1].mxu1 }
  0xfc   : > { %v692_v12 = vmul.f32 -2.0, %v533_v11  ;;  %v708_v13 = vmul.f32 -2.0, %v613_v24  ;;  %v3762_v11 = vmov 0.0  }
  0xfd   : > { %v725_v15 = vadd.f32 %v693_v9, %v267_v49  ;;  %v741_v16 = vadd.f32 %v709_v10, %v315_v2  ;;  %v324_v49 = vpop.xlane.xlu0 %323  ;;  %v333_v10 = vpop.xlane.xlu1 %332 }
  0xfe   : > { %v724_v14 = vadd.f32 %v692_v12, %v264_v47  ;;  %v740_v18 = vadd.f32 %v708_v13, %v312_v4  ;;  %v1858_v19 = vpop.f32.mrb[2].mxu0  ;;  %v1882_v20 = vpop.f32.mrb[2].mxu1 }
  0xff   : > { %v2504_v21 = vadd.f32 %v725_v15, %v2501_v8  ;;  %v2507_v22 = vadd.f32 %v741_v16, %v2501_v8  ;;  %v695_v23 = vmul.f32 -2.0, %v1858_v19  ;;  %v711_v25 = vmul.f32 -2.0, %v1882_v20  ;;  %v543_v26 = vpop.f32.mrb[3].mxu0  ;;  %v623_v27 = vpop.f32.mrb[3].mxu1 }
 0x100   : > { %v2510_v28 = vadd.f32 %v724_v14, %v2501_v8  ;;  %v2513_v29 = vadd.f32 %v740_v18, %v2501_v8  ;;  %v694_v30 = vmul.f32 -2.0, %v543_v26  ;;  %v710_v31 = vmul.f32 -2.0, %v623_v27 }
 0x101   : > { %v727_v32 = vadd.f32 %v695_v23, %v273_v48  ;;  %v743_v33 = vadd.f32 %v711_v25, %v321_v5  ;;  %v805_v39 = vmax.f32 %v2507_v22, 0.0  ;;  %v789_v7 = vmax.f32 %v2504_v21, 0.0  ;;  %v339_v12 = vpop.xlane.xlu1 %338 }
 0x102   : > { %v726_v35 = vadd.f32 %v694_v30, %v270_v46  ;;  %v742_v36 = vadd.f32 %v710_v31, %v318_v17  ;;  %v1861_v37 = vpop.f32.mrb[4].mxu0  ;;  %v1885_v38 = vpop.f32.mrb[4].mxu1  ;;  %v804_v45 = vmax.f32 %v2513_v29, 0.0 }
 0x103   : > { %v2517_v40 = vadd.f32 %v727_v32, %v2501_v8  ;;  %v2520_v41 = vadd.f32 %v743_v33, %v2501_v8  ;;  %v697_v42 = vmul.f32 -2.0, %v1861_v37  ;;  %v553_v43 = vpop.f32.mrb[5].mxu0  ;;  %v633_v44 = vpop.f32.mrb[5].mxu1  ;;  %vm837_vm1 = vcmp.le.f32.partialorder %v805_v39, 0.0 }
 0x104   : > { %v2524_v47 = vadd.f32 %v726_v35, %v2501_v8  ;;  %v2527_v46 = vadd.f32 %v742_v36, %v2501_v8  ;;  %v713_v2 = vmul.f32 -2.0, %v1885_v38  ;;  %v696_v3 = vmul.f32 -2.0, %v553_v43  ;;  %v330_v31 = vpop.xlane.xlu0 %329 }
 0x105   : > { %v807_v48 = vmax.f32 %v2520_v41, 0.0  ;;  %v729_v60 = vadd.f32 %v697_v42, %v2475_v50  ;;  %vm836_vm2 = vcmp.le.f32.partialorder %v804_v45, 0.0  ;;  %v712_v9 = vmul.f32 -2.0, %v633_v44 }
 0x106   : > { %v806_v58 = vmax.f32 %v2527_v46, 0.0  ;;  %v1864_v63 = vpop.f32.mrb[6].mxu0  ;;  %v1888_v1 = vpop.f32.mrb[6].mxu1  ;;  %v728_v50 = vadd.f32 %v696_v3, %v2477_v51  ;;  %v2547_v24 = vsel %vm837_vm1, 1.0, %v3762_v11  ;;  %v745_v13 = vadd.f32 %v713_v2, %v327_v34 }
 0x107   : > { %v563_v4 = vpop.f32.mrb[7].mxu0  ;;  %v643_v5 = vpop.f32.mrb[7].mxu1  ;;  %v2537_v6 = vadd.f32 %v729_v60, %v2501_v8  ;;  %vm2541_vm3 = vcmp.le.f32.partialorder %v807_v48, 0.0  ;;  %v699_v15 = vmul.f32 -2.0, %v1864_v63  ;;  %v2556_v14 = vsel %vm836_vm2, 1.0, %v3762_v11 }
 0x108   : > { %vm2551_vm4 = vcmp.le.f32.partialorder %v806_v58, 0.0  ;;  %v2559_v51 = vadd.f32 %v728_v50, %v2501_v8  ;;  %v744_v18 = vadd.f32 %v712_v9, %v324_v49  ;;  %v715_v19 = vmul.f32 -2.0, %v1888_v1 }
 0x109   : > { %v2564_v25 = vsel %vm2541_vm3, 1.0, %v3762_v11  ;;  %v2567_v26 = vadd.f32 %v745_v13, %v2501_v8  ;;  %v731_v27 = vadd.f32 %v699_v15, %v2479_v52  ;;  %v698_v30 = vmul.f32 -2.0, %v563_v4 }
 0x10a   : > { %v1867_v16 = vpop.f32.mrb[8].mxu0  ;;  %v1891_v17 = vpop.f32.mrb[8].mxu1  ;;  %v2573_v32 = vsel %vm2551_vm4, 1.0, %v3762_v11  ;;  %v2576_v33 = vadd.f32 %v744_v18, %v2501_v8  ;;  %v714_v34 = vmul.f32 -2.0, %v643_v5  ;;  %v747_v35 = vadd.f32 %v715_v19, %v333_v10 }
 0x10b   : > { %v573_v20 = vpop.f32.mrb[9].mxu0  ;;  %v653_v23 = vpop.f32.mrb[9].mxu1  ;;  %v809_v36 = vmax.f32 %v2567_v26, 0.0  ;;  %v2580_v37 = vadd.f32 %v731_v27, %v2501_v8  ;;  %v730_v38 = vadd.f32 %v698_v30, %v2481_v53  ;;  %v701_v52 = vmul.f32 -2.0, %v1867_v16 }
 0x10c   : > { %v808_v44 = vmax.f32 %v2576_v33, 0.0  ;;  %v2585_v49 = vadd.f32 %v747_v35, %v2501_v8  ;;  %v746_v60 = vadd.f32 %v714_v34, %v330_v31  ;;  %v700_v63 = vmul.f32 -2.0, %v573_v20 }
 0x10d   : > { %v933_v3 = vmul.f32 1e-16, %v2547_v24  ;;  %v932_v4 = vmul.f32 1e-16, %v2556_v14  ;;  %v2592_v5 = vadd.f32 %v730_v38, %v2501_v8  ;;  %v733_v53 = vadd.f32 %v701_v52, %v2483_v54 }
 0x10e   : > { %v1870_v42 = vpop.f32.mrb[10].mxu0  ;;  %v1894_v43 = vpop.f32.mrb[10].mxu1  ;;  %v935_v50 = vmul.f32 1e-16, %v2564_v25  ;;  %v934_v9 = vmul.f32 1e-16, %v2573_v32  ;;  %v2599_v10 = vadd.f32 %v746_v60, %v2501_v8  ;;  %v732_v30 = vadd.f32 %v700_v63, %v2485_v55 }
 0x10f   : > { %v583_v1 = vpop.f32.mrb[11].mxu0  ;;  %v2587_v2 = vpop.f32.mrb[11].mxu1  ;;  %v788_v13 = vmax.f32 %v2510_v28, 0.0  ;;  %vm2605_vm5 = vcmp.le.f32.partialorder %v809_v36, 0.0  ;;  %v2610_v54 = vadd.f32 %v733_v53, %v2501_v8  ;;  %vm840_vm6 = vcmp.le.f32.partialorder %v808_v44, 0.0 }
 0x110   : > { %v811_v27 = vmax.f32 %v2585_v49, 0.0  ;;  %v2623_v35 = vadd.f32 %v933_v3, %v805_v39  ;;  %v2627_v38 = vadd.f32 %v932_v4, %v804_v45  ;;  %v717_v60 = vmul.f32 -2.0, %v1891_v17  ;;  %v336_v39 = vpop.xlane.xlu0 %335 }
 0x111   : > { %v2632_v53 = vadd.f32 %v935_v50, %v807_v48  ;;  %v2636_v55 = vadd.f32 %v934_v9, %v806_v58  ;;  %v2641_v22 = vsel %vm2605_vm5, 1.0, %v3762_v11  ;;  %v2644_v29 = vadd.f32 %v732_v30, %v2501_v8 }
 0x112   : > { %v1873_v18 = vpop.f32.mrb[12].mxu0  ;;  %v2612_v19 = vpop.f32.mrb[12].mxu1  ;;  %v2647_v45 = vsel %vm840_vm6, 1.0, %v3762_v11  ;;  %v716_v17 = vmul.f32 -2.0, %v653_v23  ;;  %v703_v41 = vmul.f32 -2.0, %v1870_v42  ;;  %v749_v48 = vadd.f32 %v717_v60, %v339_v12 }
 0x113   : > { %v593_v31 = vpop.f32.mrb[13].mxu0  ;;  %v2619_v34 = vpop.f32.mrb[13].mxu1  ;;  %vm2654_vm7 = vcmp.le.f32.partialorder %v811_v27, 0.0  ;;  %v810_v4 = vmax.f32 %v2599_v10, 0.0  ;;  %v702_v50 = vmul.f32 -2.0, %v583_v1  ;;  %v705_v30 = vmul.f32 -2.0, %v1873_v18 }
 0x114   : > { %v735_v23 = vadd.f32 %v703_v41, %v2487_v56  ;;  %v2663_v42 = vadd.f32 %v749_v48, %v2501_v8  ;;  %v748_v12 = vadd.f32 %v716_v17, %v336_v39  ;;  %v937_v60 = vmul.f32 1e-16, %v2641_v22  ;;  %v345_v17 = vpop.xlane.xlu1 %344 }
 0x115   : > { %v936_v46 = vmul.f32 1e-16, %v2647_v45  ;;  %v734_v52 = vadd.f32 %v702_v50, %v2489_v57  ;;  %v704_v20 = vmul.f32 -2.0, %v593_v31  ;;  %v737_v56 = vadd.f32 %v705_v30, %v2492_v59 }
 0x116   : > { %v1876_v63 = vpop.f32.mrb[14].mxu0  ;;  %v2649_v3 = vpop.f32.mrb[14].mxu1  ;;  %v2669_v15 = vadd.f32 %v735_v23, %v2501_v8  ;;  %v2672_v1 = vadd.f32 %v748_v12, %v2501_v8  ;;  %v719_v41 = vmul.f32 -2.0, %v1894_v43  ;;  %v2678_v18 = vsel %vm2654_vm7, 1.0, %v3762_v11 }
 0x117   : > { %v603_v9 = vpop.f32.mrb[15].mxu0  ;;  %v2659_v16 = vpop.f32.mrb[15].mxu1  ;;  %v2681_v39 = vadd.f32 %v734_v52, %v2501_v8  ;;  %v736_v57 = vadd.f32 %v704_v20, %v2495_v61  ;;  %v707_v31 = vmul.f32 -2.0, %v1876_v63  ;;  %vm842_vm8 = vcmp.le.f32.partialorder %v810_v4, 0.0 }
 0x118   : > { %v813_v48 = vmax.f32 %v2663_v42, 0.0  ;;  %v2688_v59 = vadd.f32 %v737_v56, %v2501_v8  ;;  %v718_v43 = vmul.f32 -2.0, %v2587_v2  ;;  %v812_v50 = vmax.f32 %v2672_v1, 0.0  ;;  %v342_v20 = vpop.xlane.xlu0 %341 }
 0x119   : > { %v2694_v52 = vadd.f32 %v736_v57, %v2501_v8  ;;  %v739_v61 = vadd.f32 %v707_v31, %v2497_v62  ;;  %v2699_v63 = vadd.f32 %v937_v60, %v809_v36  ;;  %v751_v12 = vadd.f32 %v719_v41, %v345_v17 }
 0x11a   : > { %v939_v2 = vmul.f32 1e-16, %v2678_v18  ;;  %v2705_v30 = vsel %vm842_vm8, 1.0, %v3762_v11  ;;  %v706_v56 = vmul.f32 -2.0, %v603_v9  ;;  %v2712_v62 = vadd.f32 %v936_v46, %v808_v44  ;;  %v351_v46 = vpop.xlane.xlu1 %350 }
 0x11b   : > { %v2708_v1 = vadd.f32 %v739_v61, %v2501_v8  ;;  %vm845_vm9 = vcmp.le.f32.partialorder %v813_v48, 0.0  ;;  %v2715_v26 = vadd.f32 %v751_v12, %v2501_v8  ;;  %v750_v36 = vadd.f32 %v718_v43, %v342_v20 }
 0x11c   : > { %vm844_vm10 = vcmp.le.f32.partialorder %v812_v50, 0.0  ;;  %v738_v60 = vadd.f32 %v706_v56, %v2499_v0  ;;  %v721_v41 = vmul.f32 -2.0, %v2612_v19  ;;  %vm821_vm11 = vcmp.le.f32.partialorder %v789_v7, 0.0  ;;  %v348_v21 = vpop.xlane.xlu0 %347 }
 0x11d   : > { %3790 = vst [vmem:[#allocation5_spill] sm:$0xff] %v2708_v1  ;;  %v938_v57 = vmul.f32 1e-16, %v2705_v30  ;;  %v3755_v9 = vmax.f32 %v2715_v26, 0.0  ;;  %v2724_v33 = vadd.f32 %v750_v36, %v2501_v8  ;;  %v2727_v44 = vsel %vm821_vm11, 1.0, %v3762_v11 }
 0x11e   : > { %v2731_v31 = vadd.f32 %v939_v2, %v811_v27  ;;  %v2734_v0 = vsel %vm845_vm9, 1.0, %v3762_v11  ;;  %v2737_v19 = vadd.f32 %v738_v60, %v2501_v8  ;;  %v917_v17 = vmul.f32 1e-16, %v2727_v44 }
 0x11f   : > { %v2742_v61 = vsel %vm844_vm10, 1.0, %v3762_v11  ;;  %v3754_v20 = vmax.f32 %v2724_v33, 0.0  ;;  %vm820_vm12 = vcmp.le.f32.partialorder %v788_v13, 0.0  ;;  %v720_v27 = vmul.f32 -2.0, %v2619_v34 }
 0x120   : > { %3791 = vst [vmem:[#allocation6_spill] sm:$0xff] %v2737_v19  ;;  %v2749_v49 = vadd.f32 %v917_v17, %v789_v7  ;;  %v2753_v12 = vsel %vm820_vm12, 1.0, %v3762_v11  ;;  %v753_v2 = vadd.f32 %v721_v41, %v351_v46  ;;  %v2757_v56 = vadd.f32 %v938_v57, %v810_v4  ;;  %v354_v42 = vpop.xlane.xlu0 %353 }
 0x121   : > { %v941_v36 = vmul.f32 1e-16, %v2734_v0  ;;  %vm847_vm13 = vcmp.le.f32.partialorder %v3755_v9, 0.0  ;;  %v916_v60 = vmul.f32 1e-16, %v2753_v12  ;;  %vm846_vm14 = vcmp.le.f32.partialorder %v3754_v20, 0.0 }
 0x122   : > { %v940_v34 = vmul.f32 1e-16, %v2742_v61  ;;  %1971 = vrsqrt.f32 %v2749_v49  ;;  %v2776_v46 = vsel %vm847_vm13, 1.0, %v3762_v11  ;;  %v2779_v17 = vadd.f32 %v753_v2, %v2501_v8 }
 0x123   : > { %v2773_v57 = vadd.f32 %v916_v60, %v788_v13  ;;  %3792 = vst [vmem:[#allocation7_spill] sm:$0xff] %v2776_v46  ;;  %v752_v7 = vadd.f32 %v720_v27, %v348_v21  ;;  %1973 = vrsqrt.f32 %v2623_v35  ;;  %v2782_v43 = vadd.f32 %v941_v36, %v813_v48 }
 0x124   : > { %v2786_v4 = vsel %vm846_vm14, 1.0, %v3762_v11  ;;  %v2789_v28 = vadd.f32 %v940_v34, %v812_v50  ;;  %v1205_v13 = vsub.f32 1.0, %v2727_v44  ;;  %v3753_v60 = vmax.f32 %v2779_v17, 0.0 }
 0x125   : > { %3793 = vst [vmem:[#allocation8_spill] sm:$0xff] %v2786_v4  ;;  %1975 = vrsqrt.f32 %v2773_v57  ;;  %v2794_v2 = vadd.f32 %v752_v7, %v2501_v8  ;;  %v2797_v27 = vmul.f32 1e-16, %v2776_v46  ;;  %v1204_v36 = vsub.f32 1.0, %v2753_v12  ;;  %v357_v12 = vpop.xlane.xlu1 %356 }
 0x126   : > { %1977 = vrsqrt.f32 %v2627_v38  ;;  %v2803_v21 = vmul.f32 1e-16, %v2786_v4  ;;  %vm989_vm15 = vcmp.eq.f32.partialorder %v2749_v49, inf  ;;  %vm991_vm0 = vcmp.eq.f32.partialorder %v2749_v49, 0.0 }
 0x127   : > { %v992_v50 = vand.u32 2147483648, %v2749_v49  ;;  %vm982_vm1 = vcmp.eq.f32.partialorder %v2773_v57, inf  ;;  %vm1101_vm2 = vcmp.eq.f32.partialorder %v2623_v35, inf  ;;  %v723_v44 = vmul.f32 -2.0, %v2649_v3 }
 0x128   : > { %v3794_v7 = vmax.f32 %v2517_v40, 0.0  ;;  %vm984_vm4 = vcmp.eq.f32.partialorder %v2773_v57, 0.0  ;;  %v985_v34 = vand.u32 2147483648, %v2773_v57  ;;  %vm849_vm5 = vcmp.le.f32.partialorder %v3753_v60, 0.0 }
 0x129   : > { %v722_v10 = vmul.f32 -2.0, %v2659_v16  ;;  %vm1103_vm6 = vcmp.eq.f32.partialorder %v2623_v35, 0.0  ;;  %v1104_v3 = vand.u32 2147483648, %v2623_v35  ;;  %v1221_v60 = vsub.f32 1.0, %v2547_v24 }
 0x12a   : > { %vm823_vm3 = vcmp.le.f32.partialorder %v3794_v7, 0.0  ;;  %v3795_v7 = vmax.f32 %v2524_v47, 0.0  ;;  %v755_v9 = vadd.f32 %v723_v44, %v357_v12  ;;  %v2833_v19 = vsel %vm849_vm5, 1.0, %v3762_v11 }
 0x12b   : > { %v2818_v48 = vsel %vm823_vm3, 1.0, %v3762_v11  ;;  %v3796_v1 = vmax.f32 %v2517_v40, 0.0  ;;  %vm1094_vm8 = vcmp.eq.f32.partialorder %v2627_v38, inf  ;;  %v754_v58 = vadd.f32 %v722_v10, %v354_v42 }
 0x12c   : > { %v919_v41 = vmul.f32 1e-16, %v2818_v48  ;;  %vm822_vm7 = vcmp.le.f32.partialorder %v3795_v7, 0.0  ;;  %v1972_v23 = vpop.eup %1971  ;;  %v2842_v24 = vadd.f32 %v755_v9, %v2501_v8  ;;  %1979 = vrsqrt.f32 %v2632_v53 }
 0x12d   : > { %v2829_v20 = vsel %vm822_vm7, 1.0, %v3762_v11  ;;  %v988_v16 = vmul.f32 %v1972_v23, %v2749_v49  ;;  %v1974_v46 = vpop.eup %1973  ;;  %v945_v42 = vmul.f32 1e-16, %v2833_v19  ;;  %v3797_v10 = vmax.f32 %v2794_v2, 0.0 }
 0x12e   : > { %v2837_v4 = vadd.f32 %v919_v41, %v3796_v1  ;;  %v918_v7 = vmul.f32 1e-16, %v2829_v20  ;;  %v1100_v40 = vmul.f32 %v1974_v46, %v2623_v35  ;;  %v1097_v1 = vand.u32 2147483648, %v2627_v38 }
 0x12f   : > { %v1976_v44 = vpop.eup %1975  ;;  %v990_v23 = vsel %vm989_vm15, %v2749_v49, %v988_v16  ;;  %vm2857_vm9 = vcmp.le.f32.partialorder %v3797_v10, 0.0  ;;  %v3800_v49 = vmax.f32 %v2524_v47, 0.0  ;;  %vm1096_vm10 = vcmp.eq.f32.partialorder %v2627_v38, 0.0 }
 0x130   : > { %1981 = vrsqrt.f32 %v2837_v4  ;;  %v993_v41 = vsel %vm991_vm0, %v992_v50, %v990_v23  ;;  %v981_v9 = vmul.f32 %v1976_v44, %v2773_v57  ;;  %v1978_v16 = vpop.eup %1977  ;;  %v1102_v46 = vsel %vm1101_vm2, %v2623_v35, %v1100_v40 }
 0x131   : > { %v2861_v11 = vmul.f32 %v1205_v13, %v993_v41  ;;  %v2868_v50 = vadd.f32 %v918_v7, %v3800_v49  ;;  %v819_v44 = vmax.f32 %v2842_v24, 0.0  ;;  %v1105_v10 = vsel %vm1103_vm6, %v1104_v3, %v1102_v46 }
 0x132   : > { %v983_v23 = vsel %vm982_vm1, %v2773_v57, %v981_v9  ;;  %v1093_v13 = vmul.f32 %v1978_v16, %v2627_v38  ;;  %v2878_v41 = vadd.f32 %v754_v58, %v2501_v8  ;;  %v2883_v7 = vmul.f32 %v1221_v60, %v1105_v10 }
 0x133   : > { %v1269_v40 = vsub.f32 0.0, %v2861_v11  ;;  %v986_v47 = vsel %vm984_vm4, %v985_v34, %v983_v23  ;;  %1983 = vrsqrt.f32 %v2868_v50  ;;  %v1220_v8 = vsub.f32 1.0, %v2556_v14 }
 0x134   : > { %v2886_v49 = vmul.f32 %v1204_v36, %v986_v47  ;;  %v1095_v35 = vsel %vm1094_vm8, %v2627_v38, %v1093_v13  ;;  %v3801_v58 = vmax.f32 %v2715_v26, 0.0  ;;  %v3802_v57 = vmov 0.0  }
 0x135   : > { %1302 = vmax.xlane.f32.xlu1 %v1269_v40  ;;  %v2903_v60 = vsel %vm2857_vm9, 1.0, %v3802_v57  ;;  %v1098_v36 = vsel %vm1096_vm10, %v1097_v1, %v1095_v35  ;;  %vm851_vm11 = vcmp.le.f32.partialorder %v819_v44, 0.0  ;;  %v3803_v34 = vmax.f32 %v2724_v33, 0.0 }
 0x136   : > { %v2896_v3 = vadd.f32 %v2797_v27, %v3801_v58  ;;  %v3766_v38 = vsub.f32 0.0, %v2886_v49  ;;  %v2908_v14 = vmul.f32 %v1220_v8, %v1098_v36  ;;  %v2911_v26 = vsel %vm851_vm11, 1.0, %v3802_v57  ;;  %v1980_v23 = vpop.eup %1979 }
 0x137   : > { %v818_v27 = vmax.f32 %v2878_v41, 0.0  ;;  %v2917_v9 = vadd.f32 %v2803_v21, %v3803_v34  ;;  %v3804_v12 = vmax.f32 %v2779_v17, 0.0  ;;  %v3765_v16 = vsub.f32 0.0, %v2883_v7 }
 0x138   : > { %v1207_v46 = vsub.f32 1.0, %v2818_v48  ;;  %1300 = vmax.xlane.f32.xlu0 %v3766_v38  ;;  %v944_v10 = vmul.f32 1e-16, %v2903_v60  ;;  %vm1003_vm12 = vcmp.eq.f32.partialorder %v2837_v4, inf  ;;  %v1206_v33 = vsub.f32 1.0, %v2829_v20 }
 0x139   : > { %v2921_v1 = vadd.f32 %v945_v42, %v3804_v12  ;;  %1985 = vrsqrt.f32 %v2636_v55  ;;  %1334 = vmax.xlane.f32.xlu1 %v3765_v16  ;;  %vm1005_vm13 = vcmp.eq.f32.partialorder %v2837_v4, 0.0  ;;  %v1006_v17 = vand.u32 2147483648, %v2837_v4 }
 0x13a   : > { %v1982_v21 = vpop.eup %1981  ;;  %v947_v48 = vmul.f32 1e-16, %v2911_v26  ;;  %v1114_v42 = vmul.f32 %v1980_v23, %v2632_v53  ;;  %v3764_v13 = vsub.f32 0.0, %v2908_v14  ;;  %vm850_vm14 = vcmp.le.f32.partialorder %v818_v27, 0.0 }
 0x13b   : > { %v1002_v47 = vmul.f32 %v1982_v21, %v2837_v4  ;;  %vm1115_vm15 = vcmp.eq.f32.partialorder %v2632_v53, inf  ;;  %v1118_v35 = vand.u32 2147483648, %v2632_v53  ;;  %v3805_v8 = vmax.f32 %v2537_v6, 0.0 }
 0x13c   : > { %v1116_v20 = vsel %vm1115_vm15, %v2632_v53, %v1114_v42  ;;  %v3806_v58 = vmax.f32 %v2559_v51, 0.0  ;;  %1332 = vmax.xlane.f32.xlu0 %v3764_v13  ;;  %vm1117_vm2 = vcmp.eq.f32.partialorder %v2632_v53, 0.0  ;;  %v1223_v34 = vsub.f32 1.0, %v2564_v25 }
 0x13d   : > { %vm825_vm0 = vcmp.le.f32.partialorder %v3805_v8, 0.0  ;;  %v1004_v36 = vsel %vm1003_vm12, %v2837_v4, %v1002_v47  ;;  %v1984_v23 = vpop.eup %1983  ;;  %v2961_v42 = vsel %vm850_vm14, 1.0, %v3802_v57  ;;  %v1119_v8 = vsel %vm1117_vm2, %v1118_v35, %v1116_v20 }
 0x13e   : > { %vm824_vm1 = vcmp.le.f32.partialorder %v3806_v58, 0.0  ;;  %v2956_v12 = vsel %vm825_vm0, 1.0, %v3802_v57  ;;  %v1007_v21 = vsel %vm1005_vm13, %v1006_v17, %v1004_v36  ;;  %v995_v47 = vmul.f32 %v1984_v23, %v2868_v50 }
 0x13f   : > { %v921_v58 = vmul.f32 1e-16, %v2956_v12  ;;  %v2964_v13 = vmul.f32 %v1207_v46, %v1007_v21  ;;  %v2968_v53 = vsel %vm824_vm1, 1.0, %v3802_v57  ;;  %1987 = vrsqrt.f32 %v2699_v63 }
 0x140   : > { %vm996_vm3 = vcmp.eq.f32.partialorder %v2868_v50, inf  ;;  %v999_v25 = vand.u32 2147483648, %v2868_v50  ;;  %v3807_v4 = vmax.f32 %v2537_v6, 0.0  ;;  %v920_v20 = vmul.f32 1e-16, %v2968_v53 }
 0x141   : > { %v1271_v46 = vsub.f32 0.0, %v2964_v13  ;;  %v997_v35 = vsel %vm996_vm3, %v2868_v50, %v995_v47  ;;  %vm998_vm4 = vcmp.eq.f32.partialorder %v2868_v50, 0.0  ;;  %v2981_v36 = vmul.f32 %v1223_v34, %v1119_v8 }
 0x142   : > { %v2975_v17 = vadd.f32 %v921_v58, %v3807_v4  ;;  %v3808_v23 = vmax.f32 %v2794_v2, 0.0  ;;  %v1000_v16 = vsel %vm998_vm4, %v999_v25, %v997_v35  ;;  %v946_v38 = vmul.f32 1e-16, %v2961_v42 }
 0x143   : > { %v1986_v6 = vpop.eup %1985  ;;  %1306 = vmax.xlane.f32.xlu1 %v1271_v46  ;;  %v2991_v58 = vmul.f32 %v1206_v33, %v1000_v16  ;;  %v2995_v50 = vadd.f32 %v947_v48, %v819_v44  ;;  %vm1108_vm5 = vcmp.eq.f32.partialorder %v2636_v55, inf  ;;  %v3809_v2 = vmax.f32 %v2559_v51, 0.0 }
 0x144   : > { %v2985_v21 = vadd.f32 %v944_v10, %v3808_v23  ;;  %1989 = vrsqrt.f32 %v2975_v17  ;;  %v1107_v34 = vmul.f32 %v1986_v6, %v2636_v55  ;;  %vm1110_vm6 = vcmp.eq.f32.partialorder %v2636_v55, 0.0 }
 0x145   : > { %v3000_v10 = vadd.f32 %v920_v20, %v3809_v2  ;;  %v1111_v8 = vand.u32 2147483648, %v2636_v55  ;;  %1991 = vrsqrt.f32 %v2712_v62  ;;  %v1270_v16 = vsub.f32 0.0, %v2991_v58 }
 0x146   : > { %v3768_v24 = vsub.f32 0.0, %v2981_v36  ;;  %v1222_v44 = vsub.f32 1.0, %v2573_v32  ;;  %v3012_v51 = vadd.f32 %v946_v38, %v818_v27  ;;  %v1109_v33 = vsel %vm1108_vm5, %v2636_v55, %v1107_v34 }
 0x147   : > { %1993 = vrsqrt.f32 %v3000_v10  ;;  %v1209_v48 = vsub.f32 1.0, %v2956_v12  ;;  %v1208_v47 = vsub.f32 1.0, %v2968_v53  ;;  %1304 = vmax.xlane.f32.xlu0 %v1270_v16  ;;  %v1112_v25 = vsel %vm1110_vm6, %v1111_v8, %v1109_v33 }
 0x148   : > { %1338 = vmax.xlane.f32.xlu1 %v3768_v24  ;;  %vm1129_vm7 = vcmp.eq.f32.partialorder %v2699_v63, inf  ;;  %v3810_v32 = vmax.f32 %v2580_v37, 0.0  ;;  %v3811_v41 = vmax.f32 %v2592_v5, 0.0  ;;  %v3026_v55 = vmul.f32 %v1222_v44, %v1112_v25 }
 0x149   : > { %1995 = vrsqrt.f32 %v2731_v31  ;;  %v1988_v12 = vpop.eup %1987  ;;  %vm1017_vm10 = vcmp.eq.f32.partialorder %v2975_v17, inf  ;;  %vm1131_vm11 = vcmp.eq.f32.partialorder %v2699_v63, 0.0  ;;  %vm1019_vm12 = vcmp.eq.f32.partialorder %v2975_v17, 0.0 }
 0x14a   : > { %vm827_vm8 = vcmp.le.f32.partialorder %v3810_v32, 0.0  ;;  %vm826_vm9 = vcmp.le.f32.partialorder %v3811_v41, 0.0  ;;  %v3767_v20 = vsub.f32 0.0, %v3026_v55  ;;  %v1020_v35 = vand.u32 2147483648, %v2975_v17 }
 0x14b   : > { %v3029_v38 = vsel %vm827_vm8, 1.0, %v3802_v57  ;;  %v3032_v27 = vsel %vm826_vm9, 1.0, %v3802_v57  ;;  %v1128_v23 = vmul.f32 %v1988_v12, %v2699_v63  ;;  %v1132_v6 = vand.u32 2147483648, %v2699_v63 }
 0x14c   : > { %v923_v53 = vmul.f32 1e-16, %v3029_v38  ;;  %v922_v4 = vmul.f32 1e-16, %v3032_v27  ;;  %v1225_v2 = vsub.f32 1.0, %v2641_v22  ;;  %v3812_v34 = vmov %v3810_v32  ;;  %1336 = vmax.xlane.f32.xlu0 %v3767_v20 }
 0x14d   : > { %v3813_v44 = vmov %v3811_v41  ;;  %vm1010_vm13 = vcmp.eq.f32.partialorder %v3000_v10, inf  ;;  %v1130_v32 = vsel %vm1129_vm7, %v2699_v63, %v1128_v23  ;;  %vm1122_vm14 = vcmp.eq.f32.partialorder %v2712_v62, inf }
 0x14e   : > { %v3047_v8 = vadd.f32 %v923_v53, %v3812_v34  ;;  %v3051_v33 = vadd.f32 %v922_v4, %v3813_v44  ;;  %v1990_v25 = vpop.eup %1989  ;;  %1997 = vrsqrt.f32 %v2757_v56  ;;  %vm1012_vm15 = vcmp.eq.f32.partialorder %v3000_v10, 0.0 }
 0x14f   : > { %v1016_v37 = vmul.f32 %v1990_v25, %v2975_v17  ;;  %v1013_v5 = vand.u32 2147483648, %v3000_v10  ;;  %v1992_v22 = vpop.eup %1991  ;;  %vm1124_vm0 = vcmp.eq.f32.partialorder %v2712_v62, 0.0  ;;  %v1125_v41 = vand.u32 2147483648, %v2712_v62 }
 0x150   : > { %1999 = vrsqrt.f32 %v3047_v8  ;;  %v1224_v12 = vsub.f32 1.0, %v2647_v45  ;;  %v1133_v23 = vsel %vm1131_vm11, %v1132_v6, %v1130_v32  ;;  %v1121_v34 = vmul.f32 %v1992_v22, %v2712_v62 }
 0x151   : > { %2001 = vrsqrt.f32 %v3051_v33  ;;  %v1994_v53 = vpop.eup %1993  ;;  %v1018_v4 = vsel %vm1017_vm10, %v2975_v17, %v1016_v37  ;;  %v1211_v44 = vsub.f32 1.0, %v3029_v38  ;;  %v1210_v45 = vsub.f32 1.0, %v3032_v27 }
 0x152   : > { %v1021_v25 = vsel %vm1019_vm12, %v1020_v35, %v1018_v4  ;;  %v1009_v20 = vmul.f32 %v1994_v53, %v3000_v10  ;;  %vm1143_vm1 = vcmp.eq.f32.partialorder %v2731_v31, inf  ;;  %v1123_v63 = vsel %vm1122_vm14, %v2712_v62, %v1121_v34 }
 0x153   : > { %v3081_v24 = vmul.f32 %v1209_v48, %v1021_v25  ;;  %vm1145_vm2 = vcmp.eq.f32.partialorder %v2731_v31, 0.0  ;;  %v1146_v6 = vand.u32 2147483648, %v2731_v31  ;;  %v1996_v38 = vpop.eup %1995  ;;  %v3091_v35 = vmul.f32 %v1225_v2, %v1133_v23 }
 0x154   : > { %v1011_v17 = vsel %vm1010_vm13, %v3000_v10, %v1009_v20  ;;  %v3814_v27 = vmax.f32 %v2610_v54, 0.0  ;;  %v3815_v48 = vmax.f32 %v2644_v29, 0.0  ;;  %v1126_v22 = vsel %vm1124_vm0, %v1125_v41, %v1123_v63 }
 0x155   : > { %v3769_v32 = vsub.f32 0.0, %v3081_v24  ;;  %v1014_v37 = vsel %vm1012_vm15, %v1013_v5, %v1011_v17  ;;  %v1142_v53 = vmul.f32 %v1996_v38, %v2731_v31  ;;  %2003 = vrsqrt.f32 %v2782_v43 }
 0x156   : > { %vm829_vm3 = vcmp.le.f32.partialorder %v3814_v27, 0.0  ;;  %vm828_vm4 = vcmp.le.f32.partialorder %v3815_v48, 0.0  ;;  %v3103_v4 = vmul.f32 %v1208_v47, %v1014_v37  ;;  %vm1031_vm5 = vcmp.eq.f32.partialorder %v3047_v8, inf }
 0x157   : > { %v3106_v20 = vsel %vm829_vm3, 1.0, %v3802_v57  ;;  %v3109_v2 = vsel %vm828_vm4, 1.0, %v3802_v57  ;;  %1310 = vmax.xlane.f32.xlu1 %v3769_v32  ;;  %v1227_v62 = vsub.f32 1.0, %v2678_v18  ;;  %vm1136_vm6 = vcmp.eq.f32.partialorder %v2757_v56, inf }
 0x158   : > { %v925_v10 = vmul.f32 1e-16, %v3106_v20  ;;  %v1998_v47 = vpop.eup %1997  ;;  %v1272_v5 = vsub.f32 0.0, %v3103_v4  ;;  %v3119_v41 = vmul.f32 %v1224_v12, %v1126_v22  ;;  %vm1033_vm7 = vcmp.eq.f32.partialorder %v3047_v8, 0.0 }
 0x159   : > { %v924_v23 = vmul.f32 1e-16, %v3109_v2  ;;  %v1289_v25 = vsub.f32 0.0, %v3091_v35  ;;  %v1144_v18 = vsel %vm1143_vm1, %v2731_v31, %v1142_v53  ;;  %v1135_v63 = vmul.f32 %v1998_v47, %v2757_v56 }
 0x15a   : > { %v2000_v34 = vpop.eup %1999  ;;  %v3816_v38 = vmov %v3814_v27  ;;  %1308 = vmax.xlane.f32.xlu0 %v1272_v5  ;;  %v1034_v48 = vand.u32 2147483648, %v3047_v8  ;;  %v1139_v37 = vand.u32 2147483648, %v2757_v56  ;;  %v3817_v22 = vmax.f32 %v2644_v29, 0.0 }
 0x15b   : > { %v3130_v17 = vadd.f32 %v925_v10, %v3816_v38  ;;  %v2002_v27 = vpop.eup %2001  ;;  %v1030_v12 = vmul.f32 %v2000_v34, %v3047_v8  ;;  %1342 = vmax.xlane.f32.xlu1 %v1289_v25  ;;  %vm1024_vm8 = vcmp.eq.f32.partialorder %v3051_v33, inf  ;;  %v1137_v53 = vsel %vm1136_vm6, %v2757_v56, %v1135_v63 }
 0x15c   : > { %v3139_v32 = vadd.f32 %v924_v23, %v3817_v22  ;;  %v1023_v54 = vmul.f32 %v2002_v27, %v3051_v33  ;;  %v1288_v10 = vsub.f32 0.0, %v3119_v41  ;;  %v1027_v47 = vand.u32 2147483648, %v3051_v33 }
 0x15d   : > { %2005 = vrsqrt.f32 %v3130_v17  ;;  %v1032_v29 = vsel %vm1031_vm5, %v3047_v8, %v1030_v12  ;;  %v1147_v23 = vsel %vm1145_vm2, %v1146_v6, %v1144_v18  ;;  %vm1026_vm9 = vcmp.eq.f32.partialorder %v3051_v33, 0.0 }
 0x15e   : > { %v1035_v34 = vsel %vm1033_vm7, %v1034_v48, %v1032_v29  ;;  %v1025_v38 = vsel %vm1024_vm8, %v3051_v33, %v1023_v54  ;;  %vm1138_vm10 = vcmp.eq.f32.partialorder %v2757_v56, 0.0  ;;  %1340 = vmax.xlane.f32.xlu0 %v1288_v10  ;;  %2007 = vrsqrt.f32 %v3139_v32 }
 0x15f   : > { %v3163_v63 = vmul.f32 %v1211_v44, %v1035_v34  ;;  %v1028_v27 = vsel %vm1026_vm9, %v1027_v47, %v1025_v38  ;;  %v1140_v12 = vsel %vm1138_vm10, %v1139_v37, %v1137_v53  ;;  %v3168_v6 = vmul.f32 %v1227_v62, %v1147_v23  ;;  %v2004_v33 = vpop.eup %2003 }
 0x160   : > { %v3166_v31 = vmul.f32 %v1210_v45, %v1028_v27  ;;  %v1226_v8 = vsub.f32 1.0, %v2705_v30  ;;  %v1213_v18 = vsub.f32 1.0, %v3106_v20  ;;  %v1212_v48 = vsub.f32 1.0, %v3109_v2 }
 0x161   : > { %v1275_v56 = vsub.f32 0.0, %v3163_v63  ;;  %vm1157_vm11 = vcmp.eq.f32.partialorder %v2782_v43, inf  ;;  %2009 = vrsqrt.f32 %v2789_v28  ;;  %v1156_v45 = vmul.f32 %v2004_v33, %v2782_v43 }
 0x162   : > { %v1274_v44 = vsub.f32 0.0, %v3166_v31  ;;  %v3177_v37 = vmul.f32 %v1226_v8, %v1140_v12  ;;  %vm1159_vm12 = vcmp.eq.f32.partialorder %v2782_v43, 0.0  ;;  %v1160_v30 = vand.u32 2147483648, %v2782_v43 }
 0x163   : > { %1314 = vmax.xlane.f32.xlu1 %v1275_v56  ;;  %v3818_v20 = vmax.f32 %v2669_v15, 0.0  ;;  %v3819_v2 = vmax.f32 %v2681_v39, 0.0  ;;  %2011 = vrsqrt.f32 %v2896_v3  ;;  %v3770_v62 = vsub.f32 0.0, %v3168_v6 }
 0x164   : > { %1312 = vmax.xlane.f32.xlu0 %v1274_v44  ;;  %vm1045_vm15 = vcmp.eq.f32.partialorder %v3130_v17, inf  ;;  %vm1047_vm0 = vcmp.eq.f32.partialorder %v3130_v17, 0.0  ;;  %v1158_v53 = vsel %vm1157_vm11, %v2782_v43, %v1156_v45  ;;  %v3775_v34 = vsub.f32 0.0, %v3177_v37 }
 0x165   : > { %vm831_vm13 = vcmp.le.f32.partialorder %v3818_v20, 0.0  ;;  %vm830_vm14 = vcmp.le.f32.partialorder %v3819_v2, 0.0  ;;  %v1048_v38 = vand.u32 2147483648, %v3130_v17  ;;  %vm1038_vm1 = vcmp.eq.f32.partialorder %v3139_v32, inf }
 0x166   : > { %v3194_v22 = vsel %vm831_vm13, 1.0, %v3802_v57  ;;  %v3197_v54 = vsel %vm830_vm14, 1.0, %v3802_v57  ;;  %vm1040_vm2 = vcmp.eq.f32.partialorder %v3139_v32, 0.0  ;;  %v1229_v12 = vsub.f32 1.0, %v2734_v0 }
 0x167   : > { %v927_v29 = vmul.f32 1e-16, %v3194_v22  ;;  %v926_v47 = vmul.f32 1e-16, %v3197_v54  ;;  %v2006_v23 = vpop.eup %2005  ;;  %1346 = vmax.xlane.f32.xlu1 %v3770_v62  ;;  %v3820_v8 = vmov %v3818_v20  ;;  %v3821_v45 = vmov %v3819_v2 }
 0x168   : > { %v1044_v27 = vmul.f32 %v2006_v23, %v3130_v17  ;;  %1344 = vmax.xlane.f32.xlu0 %v3775_v34  ;;  %v1041_v2 = vand.u32 2147483648, %v3139_v32  ;;  %v1161_v62 = vsel %vm1159_vm12, %v1160_v30, %v1158_v53  ;;  %vm1150_vm3 = vcmp.eq.f32.partialorder %v2789_v28, inf  ;;  %v2008_v0 = vpop.eup %2007 }
 0x169   : > { %v3215_v33 = vadd.f32 %v927_v29, %v3820_v8  ;;  %v3219_v20 = vadd.f32 %v926_v47, %v3821_v45  ;;  %2013 = vrsqrt.f32 %v2917_v9  ;;  %vm1152_vm4 = vcmp.eq.f32.partialorder %v2789_v28, 0.0 }
 0x16a   : > { %v1046_v15 = vsel %vm1045_vm15, %v3130_v17, %v1044_v27  ;;  %v1153_v39 = vand.u32 2147483648, %v2789_v28  ;;  %v1037_v43 = vmul.f32 %v2008_v0, %v3139_v32  ;;  %v1228_v30 = vsub.f32 1.0, %v2742_v61 }
 0x16b   : > { %2015 = vrsqrt.f32 %v3215_v33  ;;  %v1049_v29 = vsel %vm1047_vm0, %v1048_v38, %v1046_v15  ;;  %v2010_v53 = vpop.eup %2009  ;;  %v3241_v23 = vmul.f32 %v1229_v12, %v1161_v62  ;;  %v1215_v27 = vsub.f32 1.0, %v3194_v22 }
 0x16c   : > { %2017 = vrsqrt.f32 %v3219_v20  ;;  %v3239_v47 = vmul.f32 %v1213_v18, %v1049_v29  ;;  %vm1171_vm5 = vcmp.eq.f32.partialorder %v2896_v3, inf  ;;  %v1039_v17 = vsel %vm1038_vm1, %v3139_v32, %v1037_v43 }
 0x16d   : > { %v1149_v38 = vmul.f32 %v2010_v53, %v2789_v28  ;;  %v1214_v8 = vsub.f32 1.0, %v3197_v54  ;;  %vm1173_vm6 = vcmp.eq.f32.partialorder %v2896_v3, 0.0  ;;  %v2012_v61 = vpop.eup %2011  ;;  %v1042_v62 = vsel %vm1040_vm2, %v1041_v2, %v1039_v17  ;;  %v3824_v17 = vld [vmem:[#allocation7_spill] sm:$0xff] }
 0x16e   : > { %v3774_v18 = vsub.f32 0.0, %v3239_v47  ;;  %v3822_v22 = vmax.f32 %v2688_v59, 0.0  ;;  %v3823_v12 = vmax.f32 %v2694_v52, 0.0  ;;  %v3258_v45 = vmul.f32 %v1212_v48, %v1042_v62 }
 0x16f   : > { %v1151_v54 = vsel %vm1150_vm3, %v2789_v28, %v1149_v38  ;;  %v1170_v0 = vmul.f32 %v2012_v61, %v2896_v3  ;;  %v1174_v2 = vand.u32 2147483648, %v2896_v3  ;;  %v1231_v38 = vsub.f32 1.0, %v3824_v17 }
 0x170   : > { %vm833_vm7 = vcmp.le.f32.partialorder %v3822_v22, 0.0  ;;  %vm832_vm8 = vcmp.le.f32.partialorder %v3823_v12, 0.0  ;;  %1318 = vmax.xlane.f32.xlu1 %v3774_v18  ;;  %v1154_v32 = vsel %vm1152_vm4, %v1153_v39, %v1151_v54  ;;  %v3772_v43 = vsub.f32 0.0, %v3258_v45 }
 0x171   : > { %v3265_v15 = vsel %vm833_vm7, 1.0, %v3802_v57  ;;  %v3274_v29 = vsel %vm832_vm8, 1.0, %v3802_v57  ;;  %v3277_v53 = vmul.f32 %v1228_v30, %v1154_v32  ;;  %v3771_v62 = vsub.f32 0.0, %v3241_v23 }
 0x172   : > { %v929_v48 = vmul.f32 1e-16, %v3265_v15  ;;  %v928_v61 = vmul.f32 1e-16, %v3274_v29  ;;  %vm1164_vm9 = vcmp.eq.f32.partialorder %v2917_v9, inf  ;;  %v3825_v28 = vmov %v3822_v22  ;;  %1316 = vmax.xlane.f32.xlu0 %v3772_v43 }
 0x173   : > { %2019 = vrsqrt.f32 %v2921_v1  ;;  %v2014_v22 = vpop.eup %2013  ;;  %vm1059_vm10 = vcmp.eq.f32.partialorder %v3215_v33, inf  ;;  %v1172_v30 = vsel %vm1171_vm5, %v2896_v3, %v1170_v0  ;;  %vm1166_vm11 = vcmp.eq.f32.partialorder %v2917_v9, 0.0 }
 0x174   : > { %v3285_v39 = vadd.f32 %v929_v48, %v3825_v28  ;;  %v3297_v54 = vadd.f32 %v928_v61, %v3823_v12  ;;  %1350 = vmax.xlane.f32.xlu1 %v3771_v62  ;;  %vm1061_vm12 = vcmp.eq.f32.partialorder %v3215_v33, 0.0  ;;  %v1163_v32 = vmul.f32 %v2014_v22, %v2917_v9  ;;  %v3826_v62 = vld [vmem:[#allocation8_spill] sm:$0xff] }
 0x175   : > { %v2016_v59 = vpop.eup %2015  ;;  %v1167_v48 = vand.u32 2147483648, %v2917_v9  ;;  %v3773_v0 = vsub.f32 0.0, %v3277_v53  ;;  %v1062_v52 = vand.u32 2147483648, %v3215_v33  ;;  %vm1052_vm13 = vcmp.eq.f32.partialorder %v3219_v20, inf }
 0x176   : > { %2021 = vrsqrt.f32 %v3285_v39  ;;  %v2018_v17 = vpop.eup %2017  ;;  %v1058_v28 = vmul.f32 %v2016_v59, %v3215_v33  ;;  %v1175_v22 = vsel %vm1173_vm6, %v1174_v2, %v1172_v30  ;;  %v1165_v12 = vsel %vm1164_vm9, %v2917_v9, %v1163_v32 }
 0x177   : > { %2023 = vrsqrt.f32 %v3297_v54  ;;  %v1051_v61 = vmul.f32 %v2018_v17, %v3219_v20  ;;  %1348 = vmax.xlane.f32.xlu0 %v3773_v0  ;;  %vm1054_vm14 = vcmp.eq.f32.partialorder %v3219_v20, 0.0  ;;  %v1055_v17 = vand.u32 2147483648, %v3219_v20 }
 0x178   : > { %v1060_v59 = vsel %vm1059_vm10, %v3215_v33, %v1058_v28  ;;  %v1230_v43 = vsub.f32 1.0, %v3826_v62  ;;  %v1168_v30 = vsel %vm1166_vm11, %v1167_v48, %v1165_v12  ;;  %v1217_v32 = vsub.f32 1.0, %v3265_v15 }
 0x179   : > { %v1063_v3 = vsel %vm1061_vm12, %v1062_v52, %v1060_v59  ;;  %v1053_v2 = vsel %vm1052_vm13, %v3219_v20, %v1051_v61  ;;  %v3332_v28 = vmul.f32 %v1231_v38, %v1175_v22  ;;  %2025 = vrsqrt.f32 %v2985_v21 }
 0x17a   : > { %v3330_v0 = vmul.f32 %v1215_v27, %v1063_v3  ;;  %v1056_v18 = vsel %vm1054_vm14, %v1055_v17, %v1053_v2  ;;  %vm1073_vm15 = vcmp.eq.f32.partialorder %v3285_v39, inf  ;;  %v1216_v33 = vsub.f32 1.0, %v3274_v29  ;;  %v3827_v27 = vld [vmem:[#allocation5_spill] sm:$0xff] }
 0x17b   : > { %v3335_v34 = vmul.f32 %v1214_v8, %v1056_v18  ;;  %vm1185_vm0 = vcmp.eq.f32.partialorder %v2921_v1, inf  ;;  %v3341_v20 = vmul.f32 %v1230_v43, %v1168_v30  ;;  %vm1075_vm1 = vcmp.eq.f32.partialorder %v3285_v39, 0.0  ;;  %v3829_v18 = vld [vmem:[#allocation6_spill] sm:$0xff] }
 0x17c   : > { %v3777_v9 = vsub.f32 0.0, %v3330_v0  ;;  %v3828_v15 = vmax.f32 %v3827_v27, 0.0  ;;  %v3830_v48 = vmax.f32 %v3829_v18, 0.0  ;;  %2027 = vrsqrt.f32 %v2995_v50 }
 0x17d   : > { %v2020_v38 = vpop.eup %2019  ;;  %v3776_v62 = vsub.f32 0.0, %v3335_v34  ;;  %v1295_v29 = vsub.f32 0.0, %v3332_v28  ;;  %v1076_v12 = vand.u32 2147483648, %v3285_v39  ;;  %vm1066_vm4 = vcmp.eq.f32.partialorder %v3297_v54, inf }
 0x17e   : > { %vm835_vm2 = vcmp.le.f32.partialorder %v3828_v15, 0.0  ;;  %vm834_vm3 = vcmp.le.f32.partialorder %v3830_v48, 0.0  ;;  %1322 = vmax.xlane.f32.xlu1 %v3777_v9  ;;  %v1184_v43 = vmul.f32 %v2020_v38, %v2921_v1  ;;  %v1188_v59 = vand.u32 2147483648, %v2921_v1 }
 0x17f   : > { %v3348_v8 = vsel %vm835_vm2, 1.0, %v3802_v57  ;;  %v3359_v61 = vsel %vm834_vm3, 1.0, %v3802_v57  ;;  %1320 = vmax.xlane.f32.xlu0 %v3776_v62  ;;  %vm1187_vm5 = vcmp.eq.f32.partialorder %v2921_v1, 0.0  ;;  %v3831_v30 = vmov %v3828_v15 }
 0x180   : > { %v931_v52 = vmul.f32 1e-16, %v3348_v8  ;;  %v2022_v22 = vpop.eup %2021  ;;  %v930_v17 = vmul.f32 1e-16, %v3359_v61  ;;  %v1186_v57 = vsel %vm1185_vm0, %v2921_v1, %v1184_v43  ;;  %v1294_v38 = vsub.f32 0.0, %v3341_v20 }
 0x181   : > { %v2024_v3 = vpop.eup %2023  ;;  %v1072_v2 = vmul.f32 %v2022_v22, %v3285_v39  ;;  %vm1068_vm6 = vcmp.eq.f32.partialorder %v3297_v54, 0.0  ;;  %v3832_v62 = vmax.f32 %v3829_v18, 0.0  ;;  %v1069_v27 = vand.u32 2147483648, %v3297_v54 }
 0x182   : > { %v963_v15 = vadd.f32 %v931_v52, %v3831_v30  ;;  %v1065_v48 = vmul.f32 %v2024_v3, %v3297_v54  ;;  %1354 = vmax.xlane.f32.xlu1 %v1295_v29  ;;  %v1233_v43 = vsub.f32 1.0, %v2833_v19  ;;  %v1189_v52 = vsel %vm1187_vm5, %v1188_v59, %v1186_v57 }
 0x183   : > { %v3379_v9 = vadd.f32 %v930_v17, %v3832_v62  ;;  %v1074_v1 = vsel %vm1073_vm15, %v3285_v39, %v1072_v2  ;;  %1352 = vmax.xlane.f32.xlu0 %v1294_v38  ;;  %vm1178_vm7 = vcmp.eq.f32.partialorder %v2985_v21, inf  ;;  %v2026_v22 = vpop.eup %2025  ;;  %v1181_v19 = vand.u32 2147483648, %v2985_v21 }
 0x184   : > { %2029 = vrsqrt.f32 %v963_v15  ;;  %v1077_v18 = vsel %vm1075_vm1, %v1076_v12, %v1074_v1  ;;  %v1067_v62 = vsel %vm1066_vm4, %v3297_v54, %v1065_v48  ;;  %v1177_v39 = vmul.f32 %v2026_v22, %v2985_v21 }
 0x185   : > { %v3396_v17 = vmul.f32 %v1217_v32, %v1077_v18  ;;  %v1070_v3 = vsel %vm1068_vm6, %v1069_v27, %v1067_v62  ;;  %2031 = vrsqrt.f32 %v3379_v9  ;;  %vm1180_vm8 = vcmp.eq.f32.partialorder %v2985_v21, 0.0 }
 0x186   : > { %v3400_v2 = vmul.f32 %v1216_v33, %v1070_v3  ;;  %v1232_v12 = vsub.f32 1.0, %v2903_v60  ;;  %v3406_v59 = vmul.f32 %v1233_v43, %v1189_v52  ;;  %2033 = vrsqrt.f32 %v3012_v51  ;;  %v2028_v32 = vpop.eup %2027 }
 0x187   : > { %v1281_v54 = vsub.f32 0.0, %v3396_v17  ;;  %v1179_v30 = vsel %vm1178_vm7, %v2985_v21, %v1177_v39  ;;  %v1198_v60 = vmul.f32 %v2028_v32, %v2995_v50  ;;  %vm1199_vm9 = vcmp.eq.f32.partialorder %v2995_v50, inf }
 0x188   : > { %v1280_v57 = vsub.f32 0.0, %v3400_v2  ;;  %v1182_v33 = vsel %vm1180_vm8, %v1181_v19, %v1179_v30  ;;  %v3779_v1 = vsub.f32 0.0, %v3406_v59  ;;  %v1219_v21 = vsub.f32 1.0, %v3348_v8 }
 0x189   : > { %1326 = vmax.xlane.f32.xlu1 %v1281_v54  ;;  %v3415_v48 = vmul.f32 %v1232_v12, %v1182_v33  ;;  %v1218_v18 = vsub.f32 1.0, %v3359_v61  ;;  %vm1201_vm10 = vcmp.eq.f32.partialorder %v2995_v50, 0.0  ;;  %v1202_v62 = vand.u32 2147483648, %v2995_v50 }
 0x18a   : > { %1324 = vmax.xlane.f32.xlu0 %v1280_v57  ;;  %vm1087_vm11 = vcmp.eq.f32.partialorder %v963_v15, inf  ;;  %v1200_v22 = vsel %vm1199_vm9, %v2995_v50, %v1198_v60  ;;  %v1235_v3 = vsub.f32 1.0, %v2911_v26  ;;  %vm1089_vm12 = vcmp.eq.f32.partialorder %v963_v15, 0.0 }
 0x18b   : > { %v3778_v27 = vsub.f32 0.0, %v3415_v48  ;;  %v1090_v39 = vand.u32 2147483648, %v963_v15  ;;  %vm1080_vm13 = vcmp.eq.f32.partialorder %v3379_v9, inf  ;;  %vm1082_vm14 = vcmp.eq.f32.partialorder %v3379_v9, 0.0 }
 0x18c   : > { %v1083_v12 = vand.u32 2147483648, %v3379_v9  ;;  %vm1192_vm15 = vcmp.eq.f32.partialorder %v3012_v51, inf  ;;  %v1203_v33 = vsel %vm1201_vm10, %v1202_v62, %v1200_v22  ;;  %vm1194_vm0 = vcmp.eq.f32.partialorder %v3012_v51, 0.0 }
 0x18d   : > { %1358 = vmax.xlane.f32.xlu1 %v3779_v1  ;;  %v1195_v26 = vand.u32 2147483648, %v3012_v51  ;;  %v3839_v41 = vsub.f32 0.0, %v3168_v6  ;;  %v3840_v63 = vsub.f32 0.0, %v3177_v37  ;;  %v3841_v37 = vsub.f32 0.0, %v3239_v47 }
 0x18e   : > { %v2030_v43 = vpop.eup %2029  ;;  %1356 = vmax.xlane.f32.xlu0 %v3778_v27  ;;  %v3848_v17 = vsub.f32 0.0, %v3415_v48 }
 0x18f   : > { %v1086_v52 = vmul.f32 %v2030_v43, %v963_v15  ;;  %v2032_v19 = vpop.eup %2031 }
 0x190   : > { %v1079_v61 = vmul.f32 %v2032_v19, %v3379_v9  ;;  %v2034_v32 = vpop.eup %2033 }
 0x191   : > { %v1088_v8 = vsel %vm1087_vm11, %v963_v15, %v1086_v52  ;;  %v1191_v15 = vmul.f32 %v2034_v32, %v3012_v51  ;;  %v1234_v52 = vsub.f32 1.0, %v2961_v42 }
 0x192   : > { %v1091_v30 = vsel %vm1089_vm12, %v1090_v39, %v1088_v8  ;;  %v1081_v43 = vsel %vm1080_vm13, %v3379_v9, %v1079_v61  ;;  %v3448_v39 = vmul.f32 %v1235_v3, %v1203_v33  ;;  %v3833_v61 = vsub.f32 0.0, %v2886_v49 }
 0x193   : > { %v3440_v60 = vmul.f32 %v1219_v21, %v1091_v30  ;;  %v1084_v19 = vsel %vm1082_vm14, %v1083_v12, %v1081_v43  ;;  %v1193_v50 = vsel %vm1192_vm15, %v3012_v51, %v1191_v15  ;;  %v3834_v30 = vsub.f32 0.0, %v2883_v7 }
 0x194   : > { %v3446_v1 = vmul.f32 %v1218_v18, %v1084_v19  ;;  %v1196_v62 = vsel %vm1194_vm0, %v1195_v26, %v1193_v50  ;;  %v1299_v42 = vsub.f32 0.0, %v3448_v39 }
 0x195   : > { %v1283_v27 = vsub.f32 0.0, %v3440_v60  ;;  %v3454_v9 = vmul.f32 %v1234_v52, %v1196_v62  ;;  %v3835_v52 = vsub.f32 0.0, %v2908_v14 }
 0x196   : > { %v1282_v21 = vsub.f32 0.0, %v3446_v1 }
 0x197   : > { %1330 = vmax.xlane.f32.xlu1 %v1283_v27  ;;  %v1298_v18 = vsub.f32 0.0, %v3454_v9 }
 0x198   : > { %1328 = vmax.xlane.f32.xlu0 %v1282_v21 }
 0x19b   : > { %1362 = vmax.xlane.f32.xlu1 %v1299_v42 }
 0x19c   : > { %1360 = vmax.xlane.f32.xlu0 %v1298_v18 }
 0x1c2   : > { %v1303_v51 = vpop.xlane.xlu1 %1302 }
 0x1c3   : > { %v1365_v22 = vsub.f32 %v1269_v40, %v1303_v51 }
 0x1c5   : > { %v1398_v3 = vmul.f32 1.442695, %v1365_v22  ;;  %v1301_v8 = vpop.xlane.xlu0 %1300 }
 0x1c6   : > { %v1364_v12 = vsub.f32 %v3833_v61, %v1301_v8  ;;  %v1335_v32 = vpop.xlane.xlu1 %1334 }
 0x1c7   : > { %2035 = vpow2.f32 %v1398_v3  ;;  %v1381_v33 = vsub.f32 %v3834_v30, %v1335_v32  ;;  %v3836_v3 = vsub.f32 0.0, %v2981_v36  ;;  %v3837_v30 = vsub.f32 0.0, %v3026_v55 }
 0x1c8   : > { %v1396_v26 = vmul.f32 1.442695, %v1364_v12 }
 0x1c9   : > { %v1430_v43 = vmul.f32 1.442695, %v1381_v33  ;;  %v1333_v15 = vpop.xlane.xlu0 %1332 }
 0x1ca   : > { %2037 = vpow2.f32 %v1396_v26  ;;  %v1380_v19 = vsub.f32 %v3835_v52, %v1333_v15 }
 0x1cb   : > { %2039 = vpow2.f32 %v1430_v43  ;;  %v3838_v43 = vsub.f32 0.0, %v3081_v24 }
 0x1cc   : > { %v1428_v11 = vmul.f32 1.442695, %v1380_v19 }
 0x1ce   : > { %2041 = vpow2.f32 %v1428_v11 }
 0x1d0   : > { %v1307_v40 = vpop.xlane.xlu1 %1306 }
 0x1d1   : > { %v1367_v49 = vsub.f32 %v1271_v46, %v1307_v40  ;;  %v3474_v50 = vpop.eup %2035 }
 0x1d2   : > { %1462 = vadd.xlane.f32.xlu1 %v3474_v50 }
 0x1d3   : > { %v1402_v62 = vmul.f32 1.442695, %v1367_v49 }
 0x1d4   : > { %v1305_v7 = vpop.xlane.xlu0 %1304  ;;  %v3477_v22 = vpop.eup %2037 }
 0x1d5   : > { %v1339_v51 = vpop.xlane.xlu1 %1338  ;;  %2043 = vpow2.f32 %v1402_v62  ;;  %v1366_v14 = vsub.f32 %v1270_v16, %v1305_v7  ;;  %v3483_v61 = vpop.eup %2039  ;;  %1460 = vadd.xlane.f32.xlu0 %v3477_v22 }
 0x1d6   : > { %v1383_v8 = vsub.f32 %v3836_v3, %v1339_v51  ;;  %1494 = vadd.xlane.f32.xlu1 %v3483_v61 }
 0x1d7   : > { %v1400_v13 = vmul.f32 1.442695, %v1366_v14 }
 0x1d8   : > { %v1434_v46 = vmul.f32 1.442695, %v1383_v8  ;;  %v3487_v12 = vpop.eup %2041 }
 0x1d9   : > { %2045 = vpow2.f32 %v1400_v13  ;;  %v1337_v32 = vpop.xlane.xlu0 %1336  ;;  %1492 = vadd.xlane.f32.xlu0 %v3487_v12 }
 0x1da   : > { %2047 = vpow2.f32 %v1434_v46  ;;  %v1382_v58 = vsub.f32 %v3837_v30, %v1337_v32 }
 0x1dc   : > { %v1432_v36 = vmul.f32 1.442695, %v1382_v58 }
 0x1de   : > { %2049 = vpow2.f32 %v1432_v36 }
 0x1df   : > { %v3492_v16 = vpop.eup %2043 }
 0x1e0   : > { %1466 = vadd.xlane.f32.xlu1 %v3492_v16 }
 0x1e3   : > { %v3495_v26 = vpop.eup %2045 }
 0x1e4   : > { %v1311_v33 = vpop.xlane.xlu1 %1310  ;;  %v3499_v52 = vpop.eup %2047  ;;  %1464 = vadd.xlane.f32.xlu0 %v3495_v26 }
 0x1e5   : > { %v1369_v15 = vsub.f32 %v3838_v43, %v1311_v33  ;;  %1498 = vadd.xlane.f32.xlu1 %v3499_v52 }
 0x1e7   : > { %v1406_v55 = vmul.f32 1.442695, %v1369_v15  ;;  %v1309_v19 = vpop.xlane.xlu0 %1308 }
 0x1e8   : > { %v1368_v11 = vsub.f32 %v1272_v5, %v1309_v19  ;;  %v1343_v40 = vpop.xlane.xlu1 %1342  ;;  %v3507_v62 = vpop.eup %2049 }
 0x1e9   : > { %2051 = vpow2.f32 %v1406_v55  ;;  %v1385_v49 = vsub.f32 %v1289_v25, %v1343_v40  ;;  %1496 = vadd.xlane.f32.xlu0 %v3507_v62  ;;  %v3842_v40 = vsub.f32 0.0, %v3258_v45  ;;  %v3844_v45 = vsub.f32 0.0, %v3277_v53 }
 0x1ea   : > { %v1404_v24 = vmul.f32 1.442695, %v1368_v11 }
 0x1eb   : > { %v1438_v7 = vmul.f32 1.442695, %v1385_v49  ;;  %v1341_v51 = vpop.xlane.xlu0 %1340 }
 0x1ec   : > { %2053 = vpow2.f32 %v1404_v24  ;;  %v1384_v14 = vsub.f32 %v1288_v10, %v1341_v51 }
 0x1ed   : > { %2055 = vpow2.f32 %v1438_v7  ;;  %v3843_v7 = vsub.f32 0.0, %v3241_v23 }
 0x1ee   : > { %v1436_v3 = vmul.f32 1.442695, %v1384_v14 }
 0x1f0   : > { %v1315_v4 = vpop.xlane.xlu1 %1314  ;;  %2057 = vpow2.f32 %v1436_v3 }
 0x1f1   : > { %v1371_v5 = vsub.f32 %v1275_v56, %v1315_v4  ;;  %v1313_v35 = vpop.xlane.xlu0 %1312 }
 0x1f2   : > { %v1370_v25 = vsub.f32 %v1274_v44, %v1313_v35 }
 0x1f3   : > { %v1410_v8 = vmul.f32 1.442695, %v1371_v5  ;;  %v3516_v13 = vpop.eup %2051 }
 0x1f4   : > { %v1408_v46 = vmul.f32 1.442695, %v1370_v25  ;;  %v1347_v32 = vpop.xlane.xlu1 %1346  ;;  %1470 = vadd.xlane.f32.xlu1 %v3516_v13 }
 0x1f5   : > { %2059 = vpow2.f32 %v1410_v8  ;;  %v1387_v10 = vsub.f32 %v3839_v41, %v1347_v32  ;;  %v1345_v30 = vpop.xlane.xlu0 %1344  ;;  %v3845_v8 = vsub.f32 0.0, %v3330_v0 }
 0x1f6   : > { %2061 = vpow2.f32 %v1408_v46  ;;  %v1386_v56 = vsub.f32 %v3840_v63, %v1345_v30  ;;  %v3523_v58 = vpop.eup %2053 }
 0x1f7   : > { %v1442_v31 = vmul.f32 1.442695, %v1387_v10  ;;  %v3525_v44 = vpop.eup %2055  ;;  %1468 = vadd.xlane.f32.xlu0 %v3523_v58  ;;  %v3846_v10 = vsub.f32 0.0, %v3335_v34 }
 0x1f8   : > { %v1440_v36 = vmul.f32 1.442695, %v1386_v56  ;;  %1502 = vadd.xlane.f32.xlu1 %v3525_v44 }
 0x1f9   : > { %2063 = vpow2.f32 %v1442_v31 }
 0x1fa   : > { %2065 = vpow2.f32 %v1440_v36  ;;  %v3529_v6 = vpop.eup %2057 }
 0x1fb   : > { %1500 = vadd.xlane.f32.xlu0 %v3529_v6 }
 0x1fd   : > { %v1319_v33 = vpop.xlane.xlu1 %1318 }
 0x1fe   : > { %v1373_v43 = vsub.f32 %v3841_v37, %v1319_v33 }
 0x1ff   : > { %v3534_v15 = vpop.eup %2059  ;;  %v1317_v19 = vpop.xlane.xlu0 %1316 }
 0x200   : > { %v1414_v55 = vmul.f32 1.442695, %v1373_v43  ;;  %v3536_v11 = vpop.eup %2061  ;;  %v1372_v49 = vsub.f32 %v3842_v40, %v1317_v19  ;;  %1474 = vadd.xlane.f32.xlu1 %v3534_v15 }
 0x201   : > { %v1351_v24 = vpop.xlane.xlu1 %1350  ;;  %1472 = vadd.xlane.f32.xlu0 %v3536_v11 }
 0x202   : > { %2067 = vpow2.f32 %v1414_v55  ;;  %v1389_v51 = vsub.f32 %v3843_v7, %v1351_v24  ;;  %v1412_v47 = vmul.f32 1.442695, %v1372_v49  ;;  %v3847_v7 = vsub.f32 0.0, %v3406_v59 }
 0x203   : > { %v3544_v14 = vpop.eup %2063 }
 0x204   : > { %v1446_v3 = vmul.f32 1.442695, %v1389_v51  ;;  %v1349_v4 = vpop.xlane.xlu0 %1348  ;;  %v3546_v5 = vpop.eup %2065  ;;  %2069 = vpow2.f32 %v1412_v47  ;;  %1506 = vadd.xlane.f32.xlu1 %v3544_v14 }
 0x205   : > { %v1388_v35 = vsub.f32 %v3844_v45, %v1349_v4  ;;  %1504 = vadd.xlane.f32.xlu0 %v3546_v5 }
 0x206   : > { %2071 = vpow2.f32 %v1446_v3 }
 0x207   : > { %v1444_v23 = vmul.f32 1.442695, %v1388_v35 }
 0x209   : > { %2073 = vpow2.f32 %v1444_v23 }
 0x20b   : > { %v1323_v25 = vpop.xlane.xlu1 %1322 }
 0x20c   : > { %v1375_v46 = vsub.f32 %v3845_v8, %v1323_v25  ;;  %v1321_v32 = vpop.xlane.xlu0 %1320  ;;  %v3554_v41 = vpop.eup %2067 }
 0x20d   : > { %v1374_v30 = vsub.f32 %v3846_v10, %v1321_v32  ;;  %1478 = vadd.xlane.f32.xlu1 %v3554_v41 }
 0x20e   : > { %v1418_v63 = vmul.f32 1.442695, %v1375_v46  ;;  %v3559_v31 = vpop.eup %2069 }
 0x20f   : > { %v1416_v53 = vmul.f32 1.442695, %v1374_v30  ;;  %v1355_v56 = vpop.xlane.xlu1 %1354  ;;  %1476 = vadd.xlane.f32.xlu0 %v3559_v31 }
 0x210   : > { %2075 = vpow2.f32 %v1418_v63  ;;  %v1391_v36 = vsub.f32 %v1295_v29, %v1355_v56  ;;  %v1353_v33 = vpop.xlane.xlu0 %1352  ;;  %v3563_v0 = vpop.eup %2071 }
 0x211   : > { %2077 = vpow2.f32 %v1416_v53  ;;  %v1390_v37 = vsub.f32 %v1294_v38, %v1353_v33  ;;  %1510 = vadd.xlane.f32.xlu1 %v3563_v0 }
 0x212   : > { %v1450_v34 = vmul.f32 1.442695, %v1391_v36 }
 0x213   : > { %v1448_v43 = vmul.f32 1.442695, %v1390_v37  ;;  %v3569_v55 = vpop.eup %2073 }
 0x214   : > { %2079 = vpow2.f32 %v1450_v34  ;;  %1508 = vadd.xlane.f32.xlu0 %v3569_v55 }
 0x215   : > { %2081 = vpow2.f32 %v1448_v43 }
 0x216   : > { %v1327_v19 = vpop.xlane.xlu1 %1326 }
 0x217   : > { %v1377_v28 = vsub.f32 %v1281_v54, %v1327_v19  ;;  %v1325_v29 = vpop.xlane.xlu0 %1324 }
 0x218   : > { %v1376_v20 = vsub.f32 %v1280_v57, %v1325_v29 }
 0x219   : > { %v1422_v38 = vmul.f32 1.442695, %v1377_v28 }
 0x21a   : > { %v1420_v40 = vmul.f32 1.442695, %v1376_v20  ;;  %v1359_v49 = vpop.xlane.xlu1 %1358  ;;  %v3576_v24 = vpop.eup %2075 }
 0x21b   : > { %2083 = vpow2.f32 %v1422_v38  ;;  %v1393_v51 = vsub.f32 %v3847_v7, %v1359_v49  ;;  %v1357_v47 = vpop.xlane.xlu0 %1356  ;;  %v3580_v3 = vpop.eup %2077  ;;  %1482 = vadd.xlane.f32.xlu1 %v3576_v24 }
 0x21c   : > { %2085 = vpow2.f32 %v1420_v40  ;;  %v1392_v54 = vsub.f32 %v3848_v17, %v1357_v47  ;;  %1480 = vadd.xlane.f32.xlu0 %v3580_v3 }
 0x21d   : > { %v1454_v2 = vmul.f32 1.442695, %v1393_v51 }
 0x21e   : > { %v1452_v57 = vmul.f32 1.442695, %v1392_v54  ;;  %v3586_v4 = vpop.eup %2079 }
 0x21f   : > { %2087 = vpow2.f32 %v1454_v2  ;;  %v3588_v45 = vpop.eup %2081  ;;  %1514 = vadd.xlane.f32.xlu1 %v3586_v4 }
 0x220   : > { %2089 = vpow2.f32 %v1452_v57  ;;  %1512 = vadd.xlane.f32.xlu0 %v3588_v45 }
 0x224   : > { %v1331_v59 = vpop.xlane.xlu1 %1330 }
 0x225   : > { %v1379_v48 = vsub.f32 %v1283_v27, %v1331_v59  ;;  %v3594_v35 = vpop.eup %2083  ;;  %v1329_v23 = vpop.xlane.xlu0 %1328 }
 0x226   : > { %v3596_v25 = vpop.eup %2085  ;;  %v1378_v46 = vsub.f32 %v1282_v21, %v1329_v23  ;;  %1486 = vadd.xlane.f32.xlu1 %v3594_v35 }
 0x227   : > { %v1426_v8 = vmul.f32 1.442695, %v1379_v48  ;;  %1484 = vadd.xlane.f32.xlu0 %v3596_v25 }
 0x228   : > { %v1363_v32 = vpop.xlane.xlu1 %1362  ;;  %v1424_v10 = vmul.f32 1.442695, %v1378_v46 }
 0x229   : > { %2091 = vpow2.f32 %v1426_v8  ;;  %v1395_v60 = vsub.f32 %v1299_v42, %v1363_v32  ;;  %v3604_v27 = vpop.eup %2087  ;;  %v1361_v30 = vpop.xlane.xlu0 %1360 }
 0x22a   : > { %v3606_v63 = vpop.eup %2089  ;;  %2093 = vpow2.f32 %v1424_v10  ;;  %v1394_v1 = vsub.f32 %v1298_v18, %v1361_v30  ;;  %1518 = vadd.xlane.f32.xlu1 %v3604_v27 }
 0x22b   : > { %v1458_v53 = vmul.f32 1.442695, %v1395_v60  ;;  %1516 = vadd.xlane.f32.xlu0 %v3606_v63 }
 0x22c   : > { %v1456_v21 = vmul.f32 1.442695, %v1394_v1 }
 0x22d   : > { %2095 = vpow2.f32 %v1458_v53 }
 0x22e   : > { %2097 = vpow2.f32 %v1456_v21 }
 0x233   : > { %v3612_v39 = vpop.eup %2091 }
 0x234   : > { %1490 = vadd.xlane.f32.xlu1 %v3612_v39  ;;  %v3615_v42 = vpop.eup %2093 }
 0x235   : > { %1488 = vadd.xlane.f32.xlu0 %v3615_v42 }
 0x237   : > { %v3618_v56 = vpop.eup %2095 }
 0x238   : > { %1522 = vadd.xlane.f32.xlu1 %v3618_v56  ;;  %v3621_v9 = vpop.eup %2097 }
 0x239   : > { %1520 = vadd.xlane.f32.xlu0 %v3621_v9 }
 0x25f   : > { %v1463_v18 = vpop.xlane.xlu1 %1462 }
 0x260   : > { %2099 = vrcp.f32 %v1463_v18 }
 0x262   : > { %v1461_v36 = vpop.xlane.xlu0 %1460 }
 0x263   : > { %2101 = vrcp.f32 %v1461_v36  ;;  %v1495_v33 = vpop.xlane.xlu1 %1494 }
 0x264   : > { %2103 = vrcp.f32 %v1495_v33 }
 0x266   : > { %v1493_v37 = vpop.xlane.xlu0 %1492 }
 0x267   : > { %2105 = vrcp.f32 %v1493_v37 }
 0x26a   : > { %v2100_v34 = vpop.eup %2099 }
 0x26b   : > { %v1557_v43 = vmul.f32 %v2100_v34, %v3474_v50 }
 0x26d   : > { %v1467_v19 = vpop.xlane.xlu1 %1466  ;;  %v2102_v28 = vpop.eup %2101  ;;  %1589 = vst [vmem:[%s3628_s6 + $0x8] sm:$0xff] %v1557_v43 }
 0x26e   : > { %2107 = vrcp.f32 %v1467_v19  ;;  %v2104_v29 = vpop.eup %2103  ;;  %v1556_v20 = vmul.f32 %v2102_v28, %v3477_v22 }
 0x26f   : > { %v1573_v38 = vmul.f32 %v2104_v29, %v3483_v61 }
 0x270   : > { %1588 = vst [vmem:[%s3628_s6] sm:$0xff] %v1556_v20 }
 0x271   : > { %v1465_v40 = vpop.xlane.xlu0 %1464  ;;  %v2106_v49 = vpop.eup %2105  ;;  %1605 = vst [vmem:[%s3628_s6 + $0x88] sm:$0xff] %v1573_v38 }
 0x272   : > { %2109 = vrcp.f32 %v1465_v40  ;;  %v1499_v50 = vpop.xlane.xlu1 %1498  ;;  %v1572_v7 = vmul.f32 %v2106_v49, %v3487_v12 }
 0x273   : > { %2111 = vrcp.f32 %v1499_v50 }
 0x274   : > { %1604 = vst [vmem:[%s3628_s6 + $0x80] sm:$0xff] %v1572_v7 }
 0x276   : > { %v1497_v51 = vpop.xlane.xlu0 %1496 }
 0x277   : > { %2113 = vrcp.f32 %v1497_v51 }
 0x278   : > { %v2108_v47 = vpop.eup %2107 }
 0x279   : > { %v1559_v22 = vmul.f32 %v2108_v47, %v3492_v16 }
 0x27b   : > { %1591 = vst [vmem:[%s3628_s6 + $0x18] sm:$0xff] %v1559_v22 }
 0x27c   : > { %v2110_v61 = vpop.eup %2109 }
 0x27d   : > { %v2112_v17 = vpop.eup %2111  ;;  %v1558_v54 = vmul.f32 %v2110_v61, %v3495_v26 }
 0x27e   : > { %v1575_v2 = vmul.f32 %v2112_v17, %v3499_v52 }
 0x27f   : > { %1590 = vst [vmem:[%s3628_s6 + $0x10] sm:$0xff] %v1558_v54 }
 0x280   : > { %1607 = vst [vmem:[%s3628_s6 + $0x98] sm:$0xff] %v1575_v2 }
 0x281   : > { %v1471_v57 = vpop.xlane.xlu1 %1470  ;;  %v2114_v12 = vpop.eup %2113 }
 0x282   : > { %2115 = vrcp.f32 %v1471_v57  ;;  %v1574_v59 = vmul.f32 %v2114_v12, %v3507_v62 }
 0x284   : > { %v1469_v48 = vpop.xlane.xlu0 %1468  ;;  %1606 = vst [vmem:[%s3628_s6 + $0x90] sm:$0xff] %v1574_v59 }
 0x285   : > { %2117 = vrcp.f32 %v1469_v48  ;;  %v1503_v23 = vpop.xlane.xlu1 %1502 }
 0x286   : > { %2119 = vrcp.f32 %v1503_v23 }
 0x288   : > { %v1501_v16 = vpop.xlane.xlu0 %1500 }
 0x289   : > { %2121 = vrcp.f32 %v1501_v16 }
 0x28c   : > { %v2116_v8 = vpop.eup %2115 }
 0x28d   : > { %v1475_v26 = vpop.xlane.xlu1 %1474  ;;  %v1561_v52 = vmul.f32 %v2116_v8, %v3516_v13 }
 0x28e   : > { %2123 = vrcp.f32 %v1475_v26  ;;  %v1473_v46 = vpop.xlane.xlu0 %1472 }
 0x28f   : > { %2125 = vrcp.f32 %v1473_v46  ;;  %v2118_v32 = vpop.eup %2117  ;;  %1593 = vst [vmem:[%s3628_s6 + $0x28] sm:$0xff] %v1561_v52 }
 0x290   : > { %v2120_v62 = vpop.eup %2119  ;;  %v1560_v10 = vmul.f32 %v2118_v32, %v3523_v58 }
 0x291   : > { %v1507_v60 = vpop.xlane.xlu1 %1506  ;;  %v1577_v30 = vmul.f32 %v2120_v62, %v3525_v44 }
 0x292   : > { %2127 = vrcp.f32 %v1507_v60  ;;  %v1505_v53 = vpop.xlane.xlu0 %1504  ;;  %1592 = vst [vmem:[%s3628_s6 + $0x20] sm:$0xff] %v1560_v10 }
 0x293   : > { %2129 = vrcp.f32 %v1505_v53  ;;  %v2122_v1 = vpop.eup %2121  ;;  %1609 = vst [vmem:[%s3628_s6 + $0xa8] sm:$0xff] %v1577_v30 }
 0x294   : > { %v1576_v13 = vmul.f32 %v2122_v1, %v3529_v6 }
 0x296   : > { %1608 = vst [vmem:[%s3628_s6 + $0xa0] sm:$0xff] %v1576_v13 }
 0x298   : > { %v2124_v21 = vpop.eup %2123 }
 0x299   : > { %v2126_v18 = vpop.eup %2125  ;;  %v1563_v58 = vmul.f32 %v2124_v21, %v3534_v15 }
 0x29a   : > { %v1479_v36 = vpop.xlane.xlu1 %1478  ;;  %v1562_v33 = vmul.f32 %v2126_v18, %v3536_v11 }
 0x29b   : > { %2131 = vrcp.f32 %v1479_v36  ;;  %1595 = vst [vmem:[%s3628_s6 + $0x38] sm:$0xff] %v1563_v58 }
 0x29c   : > { %v2128_v44 = vpop.eup %2127  ;;  %1594 = vst [vmem:[%s3628_s6 + $0x30] sm:$0xff] %v1562_v33  ;;  %v1477_v37 = vpop.xlane.xlu0 %1476 }
 0x29d   : > { %v2130_v34 = vpop.eup %2129  ;;  %v1579_v43 = vmul.f32 %v2128_v44, %v3544_v14  ;;  %2133 = vrcp.f32 %v1477_v37 }
 0x29e   : > { %v1511_v6 = vpop.xlane.xlu1 %1510  ;;  %v1578_v19 = vmul.f32 %v2130_v34, %v3546_v5 }
 0x29f   : > { %2135 = vrcp.f32 %v1511_v6  ;;  %1611 = vst [vmem:[%s3628_s6 + $0xb8] sm:$0xff] %v1579_v43 }
 0x2a0   : > { %1610 = vst [vmem:[%s3628_s6 + $0xb0] sm:$0xff] %v1578_v19 }
 0x2a1   : > { %v1509_v15 = vpop.xlane.xlu0 %1508 }
 0x2a2   : > { %2137 = vrcp.f32 %v1509_v15 }
 0x2a5   : > { %v2132_v11 = vpop.eup %2131 }
 0x2a6   : > { %v1565_v28 = vmul.f32 %v2132_v11, %v3554_v41 }
 0x2a7   : > { %v2134_v20 = vpop.eup %2133 }
 0x2a8   : > { %v1483_v29 = vpop.xlane.xlu1 %1482  ;;  %1597 = vst [vmem:[%s3628_s6 + $0x48] sm:$0xff] %v1565_v28  ;;  %v1564_v40 = vmul.f32 %v2134_v20, %v3559_v31 }
 0x2a9   : > { %2139 = vrcp.f32 %v1483_v29  ;;  %v1481_v14 = vpop.xlane.xlu0 %1480  ;;  %v2136_v38 = vpop.eup %2135 }
 0x2aa   : > { %2141 = vrcp.f32 %v1481_v14  ;;  %v1581_v5 = vmul.f32 %v2136_v38, %v3563_v0  ;;  %1596 = vst [vmem:[%s3628_s6 + $0x40] sm:$0xff] %v1564_v40 }
 0x2ac   : > { %v1515_v49 = vpop.xlane.xlu1 %1514  ;;  %v2138_v50 = vpop.eup %2137  ;;  %1613 = vst [vmem:[%s3628_s6 + $0xc8] sm:$0xff] %v1581_v5 }
 0x2ad   : > { %2143 = vrcp.f32 %v1515_v49  ;;  %v1513_v41 = vpop.xlane.xlu0 %1512  ;;  %v1580_v7 = vmul.f32 %v2138_v50, %v3569_v55 }
 0x2ae   : > { %2145 = vrcp.f32 %v1513_v41 }
 0x2af   : > { %1612 = vst [vmem:[%s3628_s6 + $0xc0] sm:$0xff] %v1580_v7 }
 0x2b3   : > { %v1487_v51 = vpop.xlane.xlu1 %1486  ;;  %v2140_v47 = vpop.eup %2139 }
 0x2b4   : > { %2147 = vrcp.f32 %v1487_v51  ;;  %v1485_v31 = vpop.xlane.xlu0 %1484  ;;  %v2142_v22 = vpop.eup %2141  ;;  %v1567_v0 = vmul.f32 %v2140_v47, %v3576_v24 }
 0x2b5   : > { %2149 = vrcp.f32 %v1485_v31  ;;  %v1566_v61 = vmul.f32 %v2142_v22, %v3580_v3 }
 0x2b6   : > { %1599 = vst [vmem:[%s3628_s6 + $0x58] sm:$0xff] %v1567_v0 }
 0x2b7   : > { %v1519_v17 = vpop.xlane.xlu1 %1518  ;;  %v2144_v54 = vpop.eup %2143  ;;  %1598 = vst [vmem:[%s3628_s6 + $0x50] sm:$0xff] %v1566_v61 }
 0x2b8   : > { %2151 = vrcp.f32 %v1519_v17  ;;  %v1517_v55 = vpop.xlane.xlu0 %1516  ;;  %v2146_v2 = vpop.eup %2145  ;;  %v1583_v57 = vmul.f32 %v2144_v54, %v3586_v4 }
 0x2b9   : > { %2153 = vrcp.f32 %v1517_v55  ;;  %v1582_v12 = vmul.f32 %v2146_v2, %v3588_v45 }
 0x2ba   : > { %1615 = vst [vmem:[%s3628_s6 + $0xd8] sm:$0xff] %v1583_v57 }
 0x2bb   : > { %1614 = vst [vmem:[%s3628_s6 + $0xd0] sm:$0xff] %v1582_v12 }
 0x2be   : > { %v2148_v24 = vpop.eup %2147 }
 0x2bf   : > { %v2150_v59 = vpop.eup %2149  ;;  %v1569_v3 = vmul.f32 %v2148_v24, %v3594_v35 }
 0x2c0   : > { %v1568_v48 = vmul.f32 %v2150_v59, %v3596_v25 }
 0x2c1   : > { %v1491_v23 = vpop.xlane.xlu1 %1490  ;;  %1601 = vst [vmem:[%s3628_s6 + $0x68] sm:$0xff] %v1569_v3 }
 0x2c2   : > { %2155 = vrcp.f32 %v1491_v23  ;;  %v2152_v16 = vpop.eup %2151  ;;  %1600 = vst [vmem:[%s3628_s6 + $0x60] sm:$0xff] %v1568_v48  ;;  %v1489_v4 = vpop.xlane.xlu0 %1488 }
 0x2c3   : > { %v2154_v8 = vpop.eup %2153  ;;  %v1585_v45 = vmul.f32 %v2152_v16, %v3604_v27  ;;  %2157 = vrcp.f32 %v1489_v4 }
 0x2c4   : > { %v1584_v26 = vmul.f32 %v2154_v8, %v3606_v63 }
 0x2c5   : > { %v1523_v52 = vpop.xlane.xlu1 %1522  ;;  %1617 = vst [vmem:[%s3628_s6 + $0xe8] sm:$0xff] %v1585_v45 }
 0x2c6   : > { %2159 = vrcp.f32 %v1523_v52  ;;  %1616 = vst [vmem:[%s3628_s6 + $0xe0] sm:$0xff] %v1584_v26  ;;  %v1521_v35 = vpop.xlane.xlu0 %1520 }
 0x2c7   : > { %2161 = vrcp.f32 %v1521_v35 }
 0x2cc   : > { %v2156_v25 = vpop.eup %2155 }
 0x2cd   : > { %v1571_v46 = vmul.f32 %v2156_v25, %v3612_v39  ;;  %v2158_v32 = vpop.eup %2157 }
 0x2ce   : > { %v1570_v27 = vmul.f32 %v2158_v32, %v3615_v42 }
 0x2cf   : > { %1603 = vst [vmem:[%s3628_s6 + $0x78] sm:$0xff] %v1571_v46 }
 0x2d0   : > { %v2160_v63 = vpop.eup %2159  ;;  %1602 = vst [vmem:[%s3628_s6 + $0x70] sm:$0xff] %v1570_v27 }
 0x2d1   : > { %v1587_v62 = vmul.f32 %v2160_v63, %v3618_v56  ;;  %v2162_v10 = vpop.eup %2161 }
 0x2d2   : > { %v1586_v39 = vmul.f32 %v2162_v10, %v3621_v9 }
 0x2d3   : > { %1619 = vst [vmem:[%s3628_s6 + $0xf8] sm:$0xff] %v1587_v62 }
 0x2d4   : > { %1618 = vst [vmem:[%s3628_s6 + $0xf0] sm:$0xff] %v1586_v39 }
 0x2d5   : > { %2176 = shalt.err (!%p2173_p5)
}
 0x2d6   : > { %s2177_s26 = scalar_lea.hbm %s3695_s18, 4096  ;;  %s2181_s29 = scalar_lea.hbm %s3752_s2, 8192 }
 0x2d7   : > { %p2178_p6 = scmp.ne.s32.totalorder %s3695_s18, %s2177_s26  ;;  %p2182_p10 = scmp.lt.u32.totalorder %s3695_s18, %s3752_s2 }
 0x2d8   : > { %p2183_p11 = scmp.lt.u32.totalorder %s2181_s29, %s2177_s26  ;;  %p2185_p13 = scmp.lt.u32.totalorder %s2177_s26, %s3695_s18 }
 0x2d9   : > { %p2179_p7 = pnand %p2178_p6, %p2302_p4 }
 0x2da   : > { %p2184_p12 = por %p2183_p11, %p2182_p10 }
 0x2db   : > { %p2180_p9 = pneg %p2179_p7 }
 0x2dc   : > { %p2186_p0 = por %p2185_p13, %p2184_p12 }
 0x2de   : > { %p2187_p1 = pnand %p2186_p0, %p2180_p9 }
 0x2e0   : > { %2190 = shalt.err (!%p2187_p1)
}
 0x2e1   : > { %s2245_s4 = smov 128   ;;  %s2246_s5 = smov 8  }
 0x2e2   : > { %1913 = dma.vmem_to_hbm [thread:$0]  (%p2302_p4), %s3697_s8, 4096, %s3695_s18, %s3704_s12, %s2245_s4, %s2245_s4, %s2246_s5  }
 0x2e3 PF: > { %p1919_p2 = scmp.ge.s32.totalorder %s2241_s14, 2  ;;  %s1651_s6 = sand.u32 1, %s2221_s9  }
 0x2e4   : > { %s1652_s7 = scalar_lea.sflag [#allocation3], %s1651_s6 }
 0x2e5   : > { %p1916_p3 = pnand %p1919_p2, %p2309_p8 }
 0x2e7   : > { %2216 = dma.done.wait (!%p1916_p3), %s1652_s7, 4096  }
 0x2e8   : > { %2218 = vsyncadd (!%p1916_p3), %s1652_s7, 4294963200  ;;  %s15_s14 = sadd.s32 1, %s2241_s14   ;;  %s3849_s9 = smov %s2225_s10 }
 0x2e9   : > { %p12_p5 = scmp.ge.s32.totalorder %s15_s14, 4   ;;  %s3850_s10 = smov %s2229_s11 }
 0x2ea   : > { %s3851_s11 = smov %s2315_s22  ;;  %s3852_s12 = smov %s2237_s13 }
 0x2eb   : > { %s3853_s13 = smov %s3855_s17  ;;  %14 = sbr.rel (!%p12_p5) target bundleno = 4 (0x4), region = 66 }
 0x2f2   :  { %1657 = vsyncpa [#allocation3], 1 }
 0x2f3   :  { %1659 = vsyncpa [#allocation3 + $0x1], 1 }

</bundles_post_ra>
